<compile_context>
chip_gen: v7x
topology: tpu7x:2x2x1
jax: 0.10.0
libtpu: 0.0.40
codegen_flags: <defaults>
</compile_context>

<pallas_src>
import functools

import numpy as np
import jax
import jax.numpy as jnp
from jax.experimental import pallas as pl
from jax.experimental.pallas import tpu as pltpu

LANES = 128


def _matrix_power(a, k):
    """Batched matrix power by repeated squaring (k: Python int >= 1)."""
    assert k >= 1
    result, base = None, a
    while k > 0:
        if k & 1:
            result = base if result is None else jnp.matmul(result, base)
        k >>= 1
        if k:
            base = jnp.matmul(base, base)
    return result


def sgcnet_kernel(*refs, n_node_lin):
    ids_ref, emb_ref = refs[0], refs[1]
    if n_node_lin > 0:
        wl_ref, bl_ref = refs[2], refs[3]
        rest = refs[4:]
    else:
        wl_ref = bl_ref = None
        rest = refs[2:]
    (prop_ref, wf_ref, bf_ref, w1_ref, b1_ref, w2_ref, b2_ref, out_ref) = rest

    m = ids_ref.shape[0]          # gpb * ng nodes in this block
    na = emb_ref.shape[0]         # padded embedding rows

    # --- embedding gather, fused as an exact one-hot matmul ----------------------
    ids = ids_ref[...]                                                     # [m, 1] i32
    onehot = (ids == jax.lax.broadcasted_iota(jnp.int32, (m, na), 1)).astype(jnp.float32)
    h = jnp.dot(onehot, emb_ref[...], preferred_element_type=jnp.float32)  # [m, H] f32

    # --- node-level Linear + ReLU stack (dropout == identity at inference) -------
    # The last Linear (no ReLU) is commuted past pooling and folded into wf_ref.
    # bf16 MXU operands, f32 accumulation; bias add / ReLU in f32.
    for i in range(n_node_lin):
        acc = jnp.dot(h.astype(jnp.bfloat16), wl_ref[i],
                      preferred_element_type=jnp.float32) + bl_ref[i]
        h = jnp.maximum(acc, 0.0)

    # --- SGConv k-hop propagation + mean_nodes, collapsed to one flat f32 dot ----
    # prop_ref row g = (mean-pool @ A^k) for graph g, block-diagonal within the block,
    # so K = gpb*ng is a single full-depth contraction.
    hg = jnp.dot(prop_ref[...], h, preferred_element_type=jnp.float32)     # [gpb, H]

    # --- fused (W_last @ W_sgc @ W0) + per-graph bias, then rest of MLPReadout ---
    # (tiny M => keep the readout chain in f32)
    y = jnp.maximum(jnp.dot(hg, wf_ref[...],
                            preferred_element_type=jnp.float32) + bf_ref[...], 0.0)
    y = jnp.maximum(jnp.dot(y, w1_ref[...],
                            preferred_element_type=jnp.float32) + b1_ref[...], 0.0)
    y = jnp.dot(y, w2_ref[...],
                preferred_element_type=jnp.float32) + b2_ref[...]          # [gpb, 128]
    out_ref[...] = y                                                        # lane-dense vst


def sgcnet_forward(atom_ids, emb_table, w_layers, b_layers, a_blocks, pool_weights,
                   w_sgc, b_sgc, w0, b0, w1, b1, w2, b2,
                   *, k_hops, graphs_per_block):
    B, ng, _ = a_blocks.shape
    na, H = emb_table.shape
    H2, H4 = w0.shape[1], w1.shape[1]
    n_lin = int(w_layers.shape[0])
    gpb = graphs_per_block
    assert B % gpb == 0
    nb = B // gpb
    M = gpb * ng

    # --- host-side graph-structure preprocessing: per-graph A^k, O(B*ng^3) -------
    a_k = _matrix_power(a_blocks, k_hops)                      # [B, ng, ng]
    prop = jnp.einsum('gn,gnm->gm', pool_weights, a_k)         # [B, ng]  (mean-pool @ A^k)
    s = jnp.sum(prop, axis=1)                                  # [B] row sums (for bias fold)
    eye = jnp.eye(gpb, dtype=prop.dtype)
    # block-diagonal prop within each grid block -> [B, gpb*ng], kept in f32
    prop_flat = (prop.reshape(nb, gpb, 1, ng) * eye[None, :, :, None]).reshape(B, M)

    # --- exact algebraic fusion (no nonlinearity between these Linears/pooling) --
    #   pool A^k (X W_last + b_last) W_sgc W0 + ... =
    #   (pool A^k X) (W_last W_sgc W0) + s * (b_last W_sgc W0) + (b_sgc W0 + b0)
    bias_tail = b_sgc.reshape(-1) @ w0 + b0.reshape(-1)        # [H2]
    if n_lin > 0:
        w_last = w_layers[-1]
        b_last = b_layers.reshape(n_lin, H)[-1]
        w_fused = w_last @ w_sgc @ w0                          # [H, H2]
        bias0 = s[:, None] * ((b_last @ w_sgc) @ w0)[None, :] + bias_tail[None, :]
    else:
        w_fused = w_sgc @ w0
        bias0 = jnp.broadcast_to(bias_tail[None, :], (B, H2))
    n_node_lin = max(n_lin - 1, 0)

    # --- weight / input packing ---------------------------------------------------
    na_pad = max(((na + 15) // 16) * 16, 16)                   # sublane-friendly table
    emb_pad = jnp.zeros((na_pad, H), jnp.float32).at[:na].set(emb_table)
    ids2d = atom_ids.reshape(B * ng, 1).astype(jnp.int32)
    # Lane-dense final readout: pad the 1-wide Linear to 128 zero lanes so the output
    # store is a full unmasked vst; column 0 is sliced back out below.
    w2_pad = jnp.zeros((H4, LANES), jnp.float32).at[:, :1].set(w2)
    b2_pad = jnp.zeros((1, LANES), jnp.float32).at[:, :1].set(b2.reshape(1, -1))

    full = lambda shape: pl.BlockSpec(shape, lambda i, _n=len(shape): (0,) * _n)

    inputs = [ids2d, emb_pad]
    in_specs = [pl.BlockSpec((M, 1), lambda i: (i, 0)),        # atom ids for this block
                full((na_pad, H))]                             # embedding table (f32)
    if n_node_lin > 0:
        inputs += [w_layers[:n_node_lin].astype(jnp.bfloat16),
                   b_layers[:n_node_lin].reshape(n_node_lin, 1, H)]
        in_specs += [full((n_node_lin, H, H)), full((n_node_lin, 1, H))]
    inputs += [prop_flat, w_fused, bias0, w1, b1.reshape(1, H4), w2_pad, b2_pad]
    in_specs += [pl.BlockSpec((gpb, M), lambda i: (i, 0)),     # block-diag pool @ A^k (f32)
                 full((H, H2)),                                # fused W_last@W_sgc@W0
                 pl.BlockSpec((gpb, H2), lambda i: (i, 0)),    # per-graph fused bias
                 full((H2, H4)), full((1, H4)),                # MLPReadout layer 1
                 full((H4, LANES)), full((1, LANES))]          # MLPReadout layer 2 (padded)

    # NOTE: constant-index weight specs could be single-buffered (pipeline_mode=Buffered(1));
    # left at the default since the whole weight footprint is ~150 KiB (VMEM never binds).
    out = pl.pallas_call(
        functools.partial(sgcnet_kernel, n_node_lin=n_node_lin),
        out_shape=jax.ShapeDtypeStruct((B, LANES), jnp.float32),
        grid=(nb,),
        in_specs=in_specs,
        out_specs=pl.BlockSpec((gpb, LANES), lambda i: (i, 0)),
        compiler_params=pltpu.CompilerParams(
            dimension_semantics=("parallel",)),                # graph blocks are independent
    )(*inputs)

    return out[:, :1]                                          # [B, 1] f32


def sgcnet_reference(atom_ids, emb_table, w_layers, b_layers, a_blocks, pool_weights,
                     w_sgc, b_sgc, w0, b0, w1, b1, w2, b2, *, k_hops):
    """Pure-JAX f32 reference matching the PyTorch forward (inference mode)."""
    B, ng, _ = a_blocks.shape
    H = emb_table.shape[1]
    n_lin = int(w_layers.shape[0])
    h = emb_table[atom_ids]                                    # [B*ng, H]
    for i in range(n_lin):
        h = h @ w_layers[i] + b_layers[i].reshape(1, H)
        if i < n_lin - 1:
            h = jnp.maximum(h, 0.0)
    h = h.reshape(B, ng, H)
    a_k = _matrix_power(a_blocks, k_hops)
    h = jnp.einsum('bnm,bmh->bnh', a_k, h) @ w_sgc + b_sgc.reshape(1, 1, H)
    hg = jnp.einsum('bn,bnh->bh', pool_weights, h)             # mean_nodes
    y = jnp.maximum(hg @ w0 + b0.reshape(1, -1), 0.0)
    y = jnp.maximum(y @ w1 + b1.reshape(1, -1), 0.0)
    return y @ w2 + b2.reshape(1, -1)


if __name__ == "__main__":
    # --- small, deterministic config (lane-filling: hidden=128, 256 nodes / grid step) ---
    num_atom_type = 28
    hidden = 128            # hidden_dim == out_dim
    L = 4                   # -> L-1 = 3 Linear(hidden, hidden) layers (last has no ReLU)
    k_hops = 8
    B = 32                  # graphs in the batch
    nodes_per_graph = 16
    graphs_per_block = 16   # M = 256 rows per grid step; grid=(2,) keeps both v7x TCs busy
    N = B * nodes_per_graph

    key = jax.random.PRNGKey(0)
    ks = jax.random.split(key, 12)

    # parameters (synthetic init; PyTorch [out,in] weights stored transposed -> [in,out])
    emb_table = jax.random.normal(ks[0], (num_atom_type, hidden), jnp.float32) * 0.1
    w_layers = jax.random.normal(ks[1], (L - 1, hidden, hidden), jnp.float32) / np.sqrt(hidden)
    b_layers = jax.random.normal(ks[2], (L - 1, 1, hidden), jnp.float32) * 0.01
    w_sgc = jax.random.normal(ks[3], (hidden, hidden), jnp.float32) / np.sqrt(hidden)
    b_sgc = jax.random.normal(ks[4], (1, hidden), jnp.float32) * 0.01
    w0 = jax.random.normal(ks[5], (hidden, hidden // 2), jnp.float32) / np.sqrt(hidden)
    b0 = jax.random.normal(ks[6], (1, hidden // 2), jnp.float32) * 0.01
    w1 = jax.random.normal(ks[7], (hidden // 2, hidden // 4), jnp.float32) / np.sqrt(hidden // 2)
    b1 = jax.random.normal(ks[8], (1, hidden // 4), jnp.float32) * 0.01
    w2 = jax.random.normal(ks[9], (hidden // 4, 1), jnp.float32) / np.sqrt(hidden // 4)
    b2 = jnp.zeros((1, 1), jnp.float32)

    # node atom types
    atom_ids = jax.random.randint(ks[10], (N,), 0, num_atom_type)

    # batched graph as per-graph blocks: B undirected ring graphs + self-loops, D^-1/2 A D^-1/2.
    # TODO(synk): self-loop policy must match the benchmarking-gnns dataset preprocessing
    # used with DGL SGConv (here: Kipf renormalization A+I).
    A = np.zeros((B, nodes_per_graph, nodes_per_graph), np.float32)
    for i in range(nodes_per_graph):
        j = (i + 1) % nodes_per_graph
        A[:, i, j] = 1.0
        A[:, j, i] = 1.0
        A[:, i, i] = 1.0
    deg = A.sum(axis=2)
    dinv = np.where(deg > 0, 1.0 / np.sqrt(np.maximum(deg, 1.0)), 0.0).astype(np.float32)
    a_blocks = jnp.asarray(dinv[:, :, None] * A * dinv[:, None, :], jnp.float32)

    # per-graph mean-pooling weights (dgl.mean_nodes)
    pool_weights = jnp.full((B, nodes_per_graph), 1.0 / nodes_per_graph, jnp.float32)

    out = sgcnet_forward(atom_ids, emb_table, w_layers, b_layers, a_blocks, pool_weights,
                         w_sgc, b_sgc, w0, b0, w1, b1, w2, b2,
                         k_hops=k_hops, graphs_per_block=graphs_per_block)
    out = jax.block_until_ready(out)
    assert out.shape == (B, 1) and out.dtype == jnp.float32
    assert bool(jnp.all(jnp.isfinite(out)))

    # correctness check vs pure-f32 reference (bf16 only in the node-level matmuls)
    ref = sgcnet_reference(atom_ids, emb_table, w_layers, b_layers, a_blocks, pool_weights,
                           w_sgc, b_sgc, w0, b0, w1, b1, w2, b2, k_hops=k_hops)
    rel_err = float(jnp.max(jnp.abs(out - ref)) / (jnp.max(jnp.abs(ref)) + 1e-6))
    assert rel_err < 0.08, f"rel_err={rel_err}"

    print("KERNEL_OK")
</pallas_src>

<mosaic_0001>
module attributes {stable_mosaic.version = 11 : i64} {
  func.func @sgcnet_kernel(%arg0: i32, %arg1: memref<256x1xi32, #tpu.memory_space<vmem>>, %arg2: memref<32x128xf32, #tpu.memory_space<vmem>>, %arg3: memref<2x128x128xbf16, #tpu.memory_space<vmem>>, %arg4: memref<2x1x128xf32, #tpu.memory_space<vmem>>, %arg5: memref<16x256xf32, #tpu.memory_space<vmem>>, %arg6: memref<128x64xf32, #tpu.memory_space<vmem>>, %arg7: memref<16x64xf32, #tpu.memory_space<vmem>>, %arg8: memref<64x32xf32, #tpu.memory_space<vmem>>, %arg9: memref<1x32xf32, #tpu.memory_space<vmem>>, %arg10: memref<32x128xf32, #tpu.memory_space<vmem>>, %arg11: memref<1x128xf32, #tpu.memory_space<vmem>>, %arg12: memref<16x128xf32, #tpu.memory_space<vmem>>) attributes {dimension_semantics = [#tpu.dimension_semantics<parallel>], iteration_bounds = array<i64: 2>, scalar_prefetch = 0 : i64, scratch_operands = 0 : i64, tpu.core_type = #tpu.core_type<tc>, window_params = [{transform_indices = @transform_0, window_bounds = array<i64: 256, 1>}, {pipeline_mode = #tpu.pipeline_mode<synchronous>, transform_indices = @transform_1, window_bounds = array<i64: 32, 128>}, {pipeline_mode = #tpu.pipeline_mode<synchronous>, transform_indices = @transform_2, window_bounds = array<i64: 2, 128, 128>}, {pipeline_mode = #tpu.pipeline_mode<synchronous>, transform_indices = @transform_3, window_bounds = array<i64: 2, 1, 128>}, {transform_indices = @transform_4, window_bounds = array<i64: 16, 256>}, {pipeline_mode = #tpu.pipeline_mode<synchronous>, transform_indices = @transform_5, window_bounds = array<i64: 128, 64>}, {transform_indices = @transform_6, window_bounds = array<i64: 16, 64>}, {pipeline_mode = #tpu.pipeline_mode<synchronous>, transform_indices = @transform_7, window_bounds = array<i64: 64, 32>}, {pipeline_mode = #tpu.pipeline_mode<synchronous>, transform_indices = @transform_8, window_bounds = array<i64: 1, 32>}, {pipeline_mode = #tpu.pipeline_mode<synchronous>, transform_indices = @transform_9, window_bounds = array<i64: 32, 128>}, {pipeline_mode = #tpu.pipeline_mode<synchronous>, transform_indices = @transform_10, window_bounds = array<i64: 1, 128>}, {transform_indices = @transform_11, window_bounds = array<i64: 16, 128>}]} {
    %c0 = arith.constant 0 : index
    %c0_0 = arith.constant 0 : index
    %0 = vector.load %arg1[%c0, %c0_0] : memref<256x1xi32, #tpu.memory_space<vmem>>, vector<256x1xi32>
    %1 = tpu.iota {dimensions = array<i32: 1>} : vector<256x32xi32>
    %2 = vector.broadcast %0 : vector<256x1xi32> to vector<256x32xi32>
    %3 = arith.cmpi eq, %2, %1 : vector<256x32xi32>
    %4 = arith.extui %3 : vector<256x32xi1> to vector<256x32xi32>
    %5 = arith.sitofp %4 : vector<256x32xi32> to vector<256x32xf32>
    %c0_1 = arith.constant 0 : index
    %c0_2 = arith.constant 0 : index
    %6 = vector.load %arg2[%c0_1, %c0_2] : memref<32x128xf32, #tpu.memory_space<vmem>>, vector<32x128xf32>
    %cst = arith.constant dense<0.000000e+00> : vector<256x128xf32>
    %7 = tpu.matmul %5, %6, %cst {dimension_numbers = #tpu.dot_dimension_numbers<[1], [0], [0], [1], [0, 0, 1, 1], [], []>} : vector<256x32xf32>, vector<32x128xf32>, vector<256x128xf32> -> vector<256x128xf32>
    %8 = arith.truncf %7 : vector<256x128xf32> to vector<256x128xbf16>
    %c0_3 = arith.constant 0 : index
    %c0_4 = arith.constant 0 : index
    %c0_5 = arith.constant 0 : index
    %9 = vector.load %arg3[%c0_3, %c0_4, %c0_5] : memref<2x128x128xbf16, #tpu.memory_space<vmem>>, vector<1x128x128xbf16>
    %10 = vector.shape_cast %9 : vector<1x128x128xbf16> to vector<128x128xbf16>
    %cst_6 = arith.constant dense<0.000000e+00> : vector<256x128xf32>
    %11 = tpu.matmul %8, %10, %cst_6 {dimension_numbers = #tpu.dot_dimension_numbers<[1], [0], [0], [1], [0, 0, 1, 1], [], []>} : vector<256x128xbf16>, vector<128x128xbf16>, vector<256x128xf32> -> vector<256x128xf32>
    %c0_7 = arith.constant 0 : index
    %c0_8 = arith.constant 0 : index
    %c0_9 = arith.constant 0 : index
    %12 = vector.load %arg4[%c0_7, %c0_8, %c0_9] : memref<2x1x128xf32, #tpu.memory_space<vmem>>, vector<1x1x128xf32>
    %13 = vector.shape_cast %12 : vector<1x1x128xf32> to vector<1x128xf32>
    %14 = vector.broadcast %13 : vector<1x128xf32> to vector<256x128xf32>
    %15 = arith.addf %11, %14 : vector<256x128xf32>
    %cst_10 = arith.constant 0.000000e+00 : f32
    %16 = vector.broadcast %cst_10 : f32 to vector<256x128xf32>
    %17 = arith.maximumf %15, %16 : vector<256x128xf32>
    %18 = arith.truncf %17 : vector<256x128xf32> to vector<256x128xbf16>
    %c1 = arith.constant 1 : index
    %c0_11 = arith.constant 0 : index
    %c0_12 = arith.constant 0 : index
    %19 = vector.load %arg3[%c1, %c0_11, %c0_12] : memref<2x128x128xbf16, #tpu.memory_space<vmem>>, vector<1x128x128xbf16>
    %20 = vector.shape_cast %19 : vector<1x128x128xbf16> to vector<128x128xbf16>
    %cst_13 = arith.constant dense<0.000000e+00> : vector<256x128xf32>
    %21 = tpu.matmul %18, %20, %cst_13 {dimension_numbers = #tpu.dot_dimension_numbers<[1], [0], [0], [1], [0, 0, 1, 1], [], []>} : vector<256x128xbf16>, vector<128x128xbf16>, vector<256x128xf32> -> vector<256x128xf32>
    %c1_14 = arith.constant 1 : index
    %c0_15 = arith.constant 0 : index
    %c0_16 = arith.constant 0 : index
    %22 = vector.load %arg4[%c1_14, %c0_15, %c0_16] : memref<2x1x128xf32, #tpu.memory_space<vmem>>, vector<1x1x128xf32>
    %23 = vector.shape_cast %22 : vector<1x1x128xf32> to vector<1x128xf32>
    %24 = vector.broadcast %23 : vector<1x128xf32> to vector<256x128xf32>
    %25 = arith.addf %21, %24 : vector<256x128xf32>
    %cst_17 = arith.constant 0.000000e+00 : f32
    %26 = vector.broadcast %cst_17 : f32 to vector<256x128xf32>
    %27 = arith.maximumf %25, %26 : vector<256x128xf32>
    %c0_18 = arith.constant 0 : index
    %c0_19 = arith.constant 0 : index
    %28 = vector.load %arg5[%c0_18, %c0_19] : memref<16x256xf32, #tpu.memory_space<vmem>>, vector<16x256xf32>
    %cst_20 = arith.constant dense<0.000000e+00> : vector<16x128xf32>
    %29 = tpu.matmul %28, %27, %cst_20 {dimension_numbers = #tpu.dot_dimension_numbers<[1], [0], [0], [1], [0, 0, 1, 1], [], []>} : vector<16x256xf32>, vector<256x128xf32>, vector<16x128xf32> -> vector<16x128xf32>
    %c0_21 = arith.constant 0 : index
    %c0_22 = arith.constant 0 : index
    %30 = vector.load %arg6[%c0_21, %c0_22] : memref<128x64xf32, #tpu.memory_space<vmem>>, vector<128x64xf32>
    %cst_23 = arith.constant dense<0.000000e+00> : vector<16x64xf32>
    %31 = tpu.matmul %29, %30, %cst_23 {dimension_numbers = #tpu.dot_dimension_numbers<[1], [0], [0], [1], [0, 0, 1, 1], [], []>} : vector<16x128xf32>, vector<128x64xf32>, vector<16x64xf32> -> vector<16x64xf32>
    %c0_24 = arith.constant 0 : index
    %c0_25 = arith.constant 0 : index
    %32 = vector.load %arg7[%c0_24, %c0_25] : memref<16x64xf32, #tpu.memory_space<vmem>>, vector<16x64xf32>
    %33 = arith.addf %31, %32 : vector<16x64xf32>
    %cst_26 = arith.constant 0.000000e+00 : f32
    %34 = vector.broadcast %cst_26 : f32 to vector<16x64xf32>
    %35 = arith.maximumf %33, %34 : vector<16x64xf32>
    %c0_27 = arith.constant 0 : index
    %c0_28 = arith.constant 0 : index
    %36 = vector.load %arg8[%c0_27, %c0_28] : memref<64x32xf32, #tpu.memory_space<vmem>>, vector<64x32xf32>
    %cst_29 = arith.constant dense<0.000000e+00> : vector<16x32xf32>
    %37 = tpu.matmul %35, %36, %cst_29 {dimension_numbers = #tpu.dot_dimension_numbers<[1], [0], [0], [1], [0, 0, 1, 1], [], []>} : vector<16x64xf32>, vector<64x32xf32>, vector<16x32xf32> -> vector<16x32xf32>
    %c0_30 = arith.constant 0 : index
    %c0_31 = arith.constant 0 : index
    %38 = vector.load %arg9[%c0_30, %c0_31] : memref<1x32xf32, #tpu.memory_space<vmem>>, vector<1x32xf32>
    %39 = vector.broadcast %38 : vector<1x32xf32> to vector<16x32xf32>
    %40 = arith.addf %37, %39 : vector<16x32xf32>
    %cst_32 = arith.constant 0.000000e+00 : f32
    %41 = vector.broadcast %cst_32 : f32 to vector<16x32xf32>
    %42 = arith.maximumf %40, %41 : vector<16x32xf32>
    %c0_33 = arith.constant 0 : index
    %c0_34 = arith.constant 0 : index
    %43 = vector.load %arg10[%c0_33, %c0_34] : memref<32x128xf32, #tpu.memory_space<vmem>>, vector<32x128xf32>
    %cst_35 = arith.constant dense<0.000000e+00> : vector<16x128xf32>
    %44 = tpu.matmul %42, %43, %cst_35 {dimension_numbers = #tpu.dot_dimension_numbers<[1], [0], [0], [1], [0, 0, 1, 1], [], []>} : vector<16x32xf32>, vector<32x128xf32>, vector<16x128xf32> -> vector<16x128xf32>
    %c0_36 = arith.constant 0 : index
    %c0_37 = arith.constant 0 : index
    %45 = vector.load %arg11[%c0_36, %c0_37] : memref<1x128xf32, #tpu.memory_space<vmem>>, vector<1x128xf32>
    %46 = vector.broadcast %45 : vector<1x128xf32> to vector<16x128xf32>
    %47 = arith.addf %44, %46 : vector<16x128xf32>
    %c0_38 = arith.constant 0 : index
    %c0_39 = arith.constant 0 : index
    %48 = vector.load %arg12[%c0_38, %c0_39] : memref<16x128xf32, #tpu.memory_space<vmem>>, vector<16x128xf32>
    tpu.vector_store %arg12[%c0_38, %c0_39], %47 {strides = array<i32>} : memref<16x128xf32, #tpu.memory_space<vmem>>, vector<16x128xf32>,
    return
  }
  func.func @transform_0(%arg0: i32) -> (i32, i32) {
    %c0_i32 = arith.constant 0 : i32
    %c0_i32_0 = arith.constant 0 : i32
    return %arg0, %c0_i32 : i32, i32
  }
  func.func @transform_1(%arg0: i32) -> (i32, i32) {
    %c0_i32 = arith.constant 0 : i32
    %c0_i32_0 = arith.constant 0 : i32
    %c0_i32_1 = arith.constant 0 : i32
    return %c0_i32, %c0_i32_0 : i32, i32
  }
  func.func @transform_2(%arg0: i32) -> (i32, i32, i32) {
    %c0_i32 = arith.constant 0 : i32
    %c0_i32_0 = arith.constant 0 : i32
    %c0_i32_1 = arith.constant 0 : i32
    %c0_i32_2 = arith.constant 0 : i32
    return %c0_i32, %c0_i32_0, %c0_i32_1 : i32, i32, i32
  }
  func.func @transform_3(%arg0: i32) -> (i32, i32, i32) {
    %c0_i32 = arith.constant 0 : i32
    %c0_i32_0 = arith.constant 0 : i32
    %c0_i32_1 = arith.constant 0 : i32
    %c0_i32_2 = arith.constant 0 : i32
    return %c0_i32, %c0_i32_0, %c0_i32_1 : i32, i32, i32
  }
  func.func @transform_4(%arg0: i32) -> (i32, i32) {
    %c0_i32 = arith.constant 0 : i32
    %c0_i32_0 = arith.constant 0 : i32
    return %arg0, %c0_i32 : i32, i32
  }
  func.func @transform_5(%arg0: i32) -> (i32, i32) {
    %c0_i32 = arith.constant 0 : i32
    %c0_i32_0 = arith.constant 0 : i32
    %c0_i32_1 = arith.constant 0 : i32
    return %c0_i32, %c0_i32_0 : i32, i32
  }
  func.func @transform_6(%arg0: i32) -> (i32, i32) {
    %c0_i32 = arith.constant 0 : i32
    %c0_i32_0 = arith.constant 0 : i32
    return %arg0, %c0_i32 : i32, i32
  }
  func.func @transform_7(%arg0: i32) -> (i32, i32) {
    %c0_i32 = arith.constant 0 : i32
    %c0_i32_0 = arith.constant 0 : i32
    %c0_i32_1 = arith.constant 0 : i32
    return %c0_i32, %c0_i32_0 : i32, i32
  }
  func.func @transform_8(%arg0: i32) -> (i32, i32) {
    %c0_i32 = arith.constant 0 : i32
    %c0_i32_0 = arith.constant 0 : i32
    %c0_i32_1 = arith.constant 0 : i32
    return %c0_i32, %c0_i32_0 : i32, i32
  }
  func.func @transform_9(%arg0: i32) -> (i32, i32) {
    %c0_i32 = arith.constant 0 : i32
    %c0_i32_0 = arith.constant 0 : i32
    %c0_i32_1 = arith.constant 0 : i32
    return %c0_i32, %c0_i32_0 : i32, i32
  }
  func.func @transform_10(%arg0: i32) -> (i32, i32) {
    %c0_i32 = arith.constant 0 : i32
    %c0_i32_0 = arith.constant 0 : i32
    %c0_i32_1 = arith.constant 0 : i32
    return %c0_i32, %c0_i32_0 : i32, i32
  }
  func.func @transform_11(%arg0: i32) -> (i32, i32) {
    %c0_i32 = arith.constant 0 : i32
    %c0_i32_0 = arith.constant 0 : i32
    return %arg0, %c0_i32 : i32, i32
  }
}

</mosaic_0001>

<bundles_post_ra>
// kernel: tpu_custom_call.1
= control target key start
LH: loop header
LB: loop body
LE: loop exit
PB: predicated region body
PF: predicated region fallthrough
CT: control target
= control target key end

     0   :  { %s3301_s0 = inlined_call_operand.vmem [shape: s32[512,1], index: 0, kind: input, shape index: {}]   ;;  %s3302_s1 = inlined_call_operand.vmem [shape: f32[32,128], index: 1, kind: input, shape index: {}]   ;;  %s3303_s2 = inlined_call_operand.vmem [shape: bf16[2,128,128], index: 2, kind: input, shape index: {}]   ;;  %s3304_s3 = inlined_call_operand.vmem [shape: f32[2,1,128], index: 3, kind: input, shape index: {}]   ;;  %s3305_s4 = inlined_call_operand.vmem [shape: f32[32,256], index: 4, kind: input, shape index: {}]   ;;  %s3306_s5 = inlined_call_operand.vmem [shape: f32[128,64], index: 5, kind: input, shape index: {}]   ;;  %s3307_s6 = inlined_call_operand.vmem [shape: f32[32,64], index: 6, kind: input, shape index: {}]   ;;  %s3308_s7 = inlined_call_operand.vmem [shape: f32[64,32], index: 7, kind: input, shape index: {}]   ;;  %s3309_s8 = inlined_call_operand.vmem [shape: f32[1,32], index: 8, kind: input, shape index: {}]   ;;  %s3310_s9 = inlined_call_operand.vmem [shape: f32[32,128], index: 9, kind: input, shape index: {}]   ;;  %s3311_s10 = inlined_call_operand.vmem [shape: f32[1,128], index: 10, kind: input, shape index: {}]   ;;  %s3312_s11 = inlined_call_operand.hbm [shape: f32[32,128], index: 11, kind: output, shape index: {}]  }
   0x1   :  { %3313 = sst [smem:[#allocation5_spill]] %s3301_s0 }
   0x2   :  { %16 = vsyncpa [#allocation3], 0 }
   0x3   :  { %18 = vsyncpa [#allocation3 + $0x1], 0  ;;  %s2800_s17 = smov 0   ;;  %s2802_s18 = smov 0  }
   0x4   :  { %s2804_s19 = smov 0   ;;  %s2806_s20 = smov 0  }
   0x5 LB: > { %s2821_s21 = sadd.s32 4294967295, %s2733_s20   ;;  %s2017_s22 = sadd.s32 4294967294, %s2733_s20   ;;  %s2733_s20 = sphi %s2806_s20, %s3320_s20   ;;  %s2729_s19 = sphi %s2804_s19, %s3319_s19   ;;  %s2725_s18 = sphi %s2802_s18, %s3318_s18   ;;  %s2721_s17 = sphi %s2800_s17, %s3317_s17  }
   0x6   : > { %s2825_s23 = sadd.s32 1, %s2733_s20   ;;  %s277_s24 = sadd.s32 1, %s2729_s19 }
   0x7   : > { %s274_s25 = ssub.s32 %s2733_s20, %s2825_s23  ;;  %p287_p0 = scmp.ne.s32.totalorder %s2729_s19, %s2725_s18 }
   0x8   : > { %p275_p1 = scmp.eq.s32.totalorder %s274_s25, 0  ;;  %p288_p2 = scmp.eq.s32.totalorder %s2821_s21, 1 }
   0x9   : > { %p293_p3 = scmp.ne.s32.totalorder %s2725_s18, %s2721_s17  ;;  %p294_p4 = scmp.eq.s32.totalorder %s2017_s22, 1 }
   0xa   : > { %s2836_s26 = scalar_select %p275_p1, %s2729_s19, %s277_s24  }
   0xb   : > { %p2838_p5 = por %p288_p2, %p287_p0  ;;  %p2842_p6 = por %p294_p4, %p293_p3 }
   0xc   : > { %p2020_p7 = scmp.ge.s32.totalorder %s2733_s20, 1  ;;  %p364_p8 = scmp.lt.s32.totalorder %s2733_s20, 3 }
   0xe   : > { %p365_p9 = pnand %p2020_p7, %p364_p8 }
   0xf   : > { %s2022_s29 = sshll.u32 (!%p365_p9), %s2821_s21, 5  ;;  %v662_v0 = vld [vmem:[%s3302_s1] sm:$0xff] (!%p365_p9)  ;;  %v663_v1 = vld [vmem:[%s3302_s1 + $0x8] sm:$0xff] (!%p365_p9)  ;;  %v2735_v2 = vmov (!%p365_p9), 0   ;;  %s3316_s0 = sld [smem:[#allocation5_spill]] (!%p365_p9)  ;;  %v664_v12 = vld [vmem:[%s3302_s1 + $0x10] sm:$0xff] (!%p365_p9)  ;;  %v468_v45 = vlaneseq (!%p365_p9) }
  0x10   : > { %368 = sbr.rel (%p365_p9) target bundleno = 1772 (0x6ec), region = 64  ;;  %2654 = vset.pattern.permute.xlu1 (!%p365_p9), %v2735_v2  ;;  %2653 = vset.pattern.permute.xlu0 (!%p365_p9), %v2735_v2  ;;  %p416_p10 = scmp.lt.s32.totalorder (!%p365_p9), %s2022_s29, 63  ;;  %v2514_v3 = vpack.c.bf16 (!%p365_p9), %v663_v1, %v662_v0  ;;  %v665_v13 = vld [vmem:[%s3302_s1 + $0x18] sm:$0xff] (!%p365_p9)  ;;  %v2655_v39 = vld [vmem:[%s3303_s2] sm:$0xff] (!%p365_p9)   ;;  %v2656_v40 = vld [vmem:[%s3303_s2 + $0x8] sm:$0xff] (!%p365_p9)   ;;  %vm666_vm0 = vcmask (!%p365_p9), 261120  }
  0x11   : > { %v2518_v16 = vpack.c.bf16 (!%p365_p9), %v665_v13, %v664_v12  ;;  %2353 = vmatprep.subr.bf16.mxu1 (!%p365_p9), %v2655_v39  ;;  %v2657_v41 = vld [vmem:[%s3303_s2 + $0x10] sm:$0xff] (!%p365_p9)   ;;  %v2658_v42 = vld [vmem:[%s3303_s2 + $0x18] sm:$0xff] (!%p365_p9)   ;;  %v2659_v43 = vld [vmem:[%s3303_s2 + $0x20] sm:$0xff] (!%p365_p9)   ;;  %v2916_v46 = vand.u32 (!%p365_p9), 127, %v468_v45  ;;  %v2736_v49 = vmov (!%p365_p9), 0.0   ;;  %s2024_s22 = sshll.u32 (!%p365_p9), %s2821_s21, 1 }
  0x12   : > { %2515 = vmatprep.subr.bf16.mxu0 (!%p365_p9), %v2514_v3  ;;  %2354 = vmatpush3.bf16.msra.mxu1 (!%p365_p9), %v2655_v39  ;;  %v2660_v44 = vld [vmem:[%s3303_s2 + $0x28] sm:$0xff] (!%p365_p9)   ;;  %p422_p11 = scmp.lt.s32.totalorder (!%p365_p9), %s2024_s22, 3 }
  0x13   : > { %2517 = vmatpush3.bf16.msra.mxu0 (!%p365_p9), %v2514_v3  ;;  %2355 = vmatprep.subr.bf16.mxu1 (!%p365_p9), %v2656_v40 }
  0x14   : > { %2519 = vmatprep.subr.bf16.mxu0 (!%p365_p9), %v2518_v16 }
  0x16   : > { %2356 = vmatpush3.bf16.msra.mxu1 (!%p365_p9), %v2656_v40 }
  0x17   : > { %s3322_s29 = smov (!%p416_p10, %s2022_s29), 63  ;;  %2521 = vmatpush3.bf16.msra.mxu0 %v2518_v16  ;;  %2357 = vmatprep.subr.bf16.mxu1 %v2657_v41  ;;  %s3324_s22 = smov (!%p422_p11, %s2024_s22), 3 }
  0x18   : > { %s2023_s15 = sshll.u32 %s3322_s29, 3  ;;  %s2139_s25 = sshll.u32 %s3324_s22, 4 }
  0x19   : > { %s2858_s24 = scalar_lea.vmem %s3316_s0, %s2023_s15  ;;  %s3088_s30 = scalar_lea.vmem %s3305_s4, %s2139_s25 }
  0x1a   : > { %v438_v4 = vld [vmem:[%s2858_s24 + $0x10] sm:$0xff]  ;;  %v436_v5 = vld [vmem:[%s2858_s24] sm:$0xff]  ;;  %v439_v6 = vld [vmem:[%s2858_s24 + $0x18] sm:$0xff]  ;;  %2358 = vmatpush3.bf16.msra.mxu1 %v2657_v41  ;;  %s2028_s12 = sshll.u32 %s3324_s22, 3  ;;  %s412_s29 = sand.u32 1, %s2725_s18  }
  0x1b   : > { %477 = vperm.xlu1 %2654, %v438_v4   ;;  %471 = vperm.xlu0 %2653, %v436_v5   ;;  %v437_v7 = vld [vmem:[%s2858_s24 + $0x8] sm:$0xff]  ;;  %v440_v9 = vld [vmem:[%s2858_s24 + $0x20] sm:$0xff]  ;;  %v443_v10 = vld [vmem:[%s2858_s24 + $0x38] sm:$0xff]  ;;  %s432_s14 = scalar_lea.vmem %s3307_s6, %s2028_s12  ;;  %s2021_s12 = sshll.u32 %s412_s29, 4 }
  0x1c   : > { %v441_v8 = vld [vmem:[%s2858_s24 + $0x28] sm:$0xff]  ;;  %v442_v11 = vld [vmem:[%s2858_s24 + $0x30] sm:$0xff]  ;;  %v444_v15 = vld [vmem:[%s2858_s24 + $0x40] sm:$0xff]  ;;  %2359 = vmatprep.subr.bf16.mxu1 %v2658_v42 }
  0x1d   : > { %v445_v14 = vld [vmem:[%s2858_s24 + $0x48] sm:$0xff]  ;;  %v447_v17 = vld [vmem:[%s2858_s24 + $0x58] sm:$0xff]  ;;  %v446_v18 = vld [vmem:[%s2858_s24 + $0x50] sm:$0xff] }
  0x1e   : > { %v449_v19 = vld [vmem:[%s2858_s24 + $0x68] sm:$0xff]  ;;  %v448_v20 = vld [vmem:[%s2858_s24 + $0x60] sm:$0xff]  ;;  %v451_v21 = vld [vmem:[%s2858_s24 + $0x78] sm:$0xff]  ;;  %2360 = vmatpush3.bf16.msra.mxu1 %v2658_v42 }
  0x1f   : > { %480 = vperm.xlu1 %2654, %v439_v6   ;;  %474 = vperm.xlu0 %2653, %v437_v7   ;;  %v450_v22 = vld [vmem:[%s2858_s24 + $0x70] sm:$0xff]  ;;  %v453_v23 = vld [vmem:[%s2858_s24 + $0x88] sm:$0xff]  ;;  %v452_v24 = vld [vmem:[%s2858_s24 + $0x80] sm:$0xff] }
  0x20   : > { %v455_v25 = vld [vmem:[%s2858_s24 + $0x98] sm:$0xff]  ;;  %v454_v26 = vld [vmem:[%s2858_s24 + $0x90] sm:$0xff]  ;;  %v457_v27 = vld [vmem:[%s2858_s24 + $0xa8] sm:$0xff]  ;;  %2361 = vmatprep.subr.bf16.mxu1 %v2659_v43 }
  0x21   : > { %v456_v28 = vld [vmem:[%s2858_s24 + $0xa0] sm:$0xff]  ;;  %v459_v29 = vld [vmem:[%s2858_s24 + $0xb8] sm:$0xff]  ;;  %v458_v30 = vld [vmem:[%s2858_s24 + $0xb0] sm:$0xff] }
  0x22   : > { %v461_v31 = vld [vmem:[%s2858_s24 + $0xc8] sm:$0xff]  ;;  %v460_v32 = vld [vmem:[%s2858_s24 + $0xc0] sm:$0xff]  ;;  %v463_v33 = vld [vmem:[%s2858_s24 + $0xd8] sm:$0xff]  ;;  %2362 = vmatpush3.bf16.msra.mxu1 %v2659_v43 }
  0x23   : > { %486 = vperm.xlu1 %2654, %v441_v8   ;;  %483 = vperm.xlu0 %2653, %v440_v9   ;;  %v462_v34 = vld [vmem:[%s2858_s24 + $0xd0] sm:$0xff]  ;;  %v465_v35 = vld [vmem:[%s2858_s24 + $0xe8] sm:$0xff]  ;;  %v464_v36 = vld [vmem:[%s2858_s24 + $0xe0] sm:$0xff] }
  0x24   : > { %v467_v37 = vld [vmem:[%s2858_s24 + $0xf8] sm:$0xff]  ;;  %v466_v38 = vld [vmem:[%s2858_s24 + $0xf0] sm:$0xff]  ;;  %2363 = vmatprep.subr.bf16.mxu1 %v2660_v44  ;;  %s3260_s24 = scalar_lea.sflag [#allocation3], %s412_s29 }
  0x26   : > { %2364 = vmatpush3.bf16.msra.mxu1 %v2660_v44 }
  0x27   : > { %492 = vperm.xlu1 %2654, %v443_v10   ;;  %489 = vperm.xlu0 %2653, %v442_v11  }
  0x2b   : > { %498 = vperm.xlu1 %2654, %v445_v14   ;;  %495 = vperm.xlu0 %2653, %v444_v15  }
  0x2f   : > { %504 = vperm.xlu1 %2654, %v447_v17   ;;  %501 = vperm.xlu0 %2653, %v446_v18  }
  0x33   : > { %510 = vperm.xlu1 %2654, %v449_v19   ;;  %507 = vperm.xlu0 %2653, %v448_v20  }
  0x37   : > { %516 = vperm.xlu1 %2654, %v451_v21   ;;  %513 = vperm.xlu0 %2653, %v450_v22  }
  0x3b   : > { %522 = vperm.xlu1 %2654, %v453_v23   ;;  %519 = vperm.xlu0 %2653, %v452_v24  }
  0x3f   : > { %528 = vperm.xlu1 %2654, %v455_v25   ;;  %525 = vperm.xlu0 %2653, %v454_v26  }
  0x43   : > { %534 = vperm.xlu1 %2654, %v457_v27   ;;  %531 = vperm.xlu0 %2653, %v456_v28  }
  0x47   : > { %540 = vperm.xlu1 %2654, %v459_v29   ;;  %537 = vperm.xlu0 %2653, %v458_v30  }
  0x4b   : > { %546 = vperm.xlu1 %2654, %v461_v31   ;;  %543 = vperm.xlu0 %2653, %v460_v32  }
  0x4f   : > { %552 = vperm.xlu1 %2654, %v463_v33   ;;  %549 = vperm.xlu0 %2653, %v462_v34  }
  0x53   : > { %558 = vperm.xlu1 %2654, %v465_v35   ;;  %555 = vperm.xlu0 %2653, %v464_v36  }
  0x57   : > { %564 = vperm.xlu1 %2654, %v467_v37   ;;  %561 = vperm.xlu0 %2653, %v466_v38  }
  0x9a   : > { %v478_v47 = vpop.permute.xlu1 %477  ;;  %v472_v48 = vpop.permute.xlu0 %471 }
  0x9b   : > { %vm566_vm1 = vcmp.eq.s32.totalorder %v472_v48, %v2916_v46  ;;  %vm568_vm2 = vcmp.eq.s32.totalorder %v478_v47, %v2916_v46 }
  0x9c   : > { %v2029_v50 = vsel %vm566_vm1, 1.0, %v2736_v49  ;;  %v2031_v53 = vsel %vm568_vm2, 1.0, %v2736_v49 }
  0x9d   : > { %2305 = vmatprep.mubr.msk.f32.mxu0 %vm666_vm0, %v2029_v50  ;;  %v2661_v50 = vld [vmem:[%s3303_s2 + $0x30] sm:$0xff]  }
  0x9e   : > { %v481_v51 = vpop.permute.xlu1 %480  ;;  %v475_v52 = vpop.permute.xlu0 %474  ;;  %2365 = vmatprep.subr.bf16.mxu1 %v2661_v50 }
  0x9f   : > { %vm567_vm3 = vcmp.eq.s32.totalorder %v475_v52, %v2916_v46  ;;  %vm569_vm4 = vcmp.eq.s32.totalorder %v481_v51, %v2916_v46  ;;  %2366 = vmatpush3.bf16.msra.mxu1 %v2661_v50  ;;  %v2664_v51 = vld [vmem:[%s3303_s2 + $0x48] sm:$0xff]   ;;  %v2665_v52 = vld [vmem:[%s3303_s2 + $0x50] sm:$0xff]  }
  0xa0   : > { %v2030_v54 = vsel %vm567_vm3, 1.0, %v2736_v49  ;;  %v2032_v57 = vsel %vm569_vm4, 1.0, %v2736_v49 }
  0xa1   : > { %2306 = vmatmul.mubr.msk.f32.vlgmr.msra.gmra.mrb[0].mxu0 %vm666_vm0, %v2030_v54  ;;  %v2667_v54 = vld [vmem:[%s3303_s2 + $0x60] sm:$0xff]  }
  0xa2   : > { %v487_v55 = vpop.permute.xlu1 %486  ;;  %2308 = vmatprep.mubr.msk.f32.mxu0 %vm666_vm0, %v2031_v53  ;;  %v484_v56 = vpop.permute.xlu0 %483  ;;  %v2666_v53 = vld [vmem:[%s3303_s2 + $0x58] sm:$0xff]  }
  0xa3   : > { %vm570_vm5 = vcmp.eq.s32.totalorder %v484_v56, %v2916_v46  ;;  %vm571_vm6 = vcmp.eq.s32.totalorder %v487_v55, %v2916_v46  ;;  %v2668_v55 = vld [vmem:[%s3303_s2 + $0x68] sm:$0xff]  }
  0xa4   : > { %v2033_v58 = vsel %vm570_vm5, 1.0, %v2736_v49  ;;  %v2034_v61 = vsel %vm571_vm6, 1.0, %v2736_v49 }
  0xa5   : > { %2309 = vmatmul.mubr.msk.f32.gmra.mrb[2].mxu0 %vm666_vm0, %v2032_v57 }
  0xa6   : > { %v493_v59 = vpop.permute.xlu1 %492  ;;  %2311 = vmatprep.mubr.msk.f32.mxu0 %vm666_vm0, %v2033_v58  ;;  %v490_v60 = vpop.permute.xlu0 %489 }
  0xa7   : > { %vm572_vm7 = vcmp.eq.s32.totalorder %v490_v60, %v2916_v46  ;;  %vm573_vm8 = vcmp.eq.s32.totalorder %v493_v59, %v2916_v46 }
  0xa8   : > { %v2035_v62 = vsel %vm572_vm7, 1.0, %v2736_v49  ;;  %v2036_v1 = vsel %vm573_vm8, 1.0, %v2736_v49 }
  0xa9   : > { %2312 = vmatmul.mubr.msk.f32.gmra.mrb[4].mxu0 %vm666_vm0, %v2034_v61 }
  0xaa   : > { %v499_v63 = vpop.permute.xlu1 %498  ;;  %2314 = vmatprep.mubr.msk.f32.mxu0 %vm666_vm0, %v2035_v62  ;;  %v496_v0 = vpop.permute.xlu0 %495 }
  0xab   : > { %vm574_vm9 = vcmp.eq.s32.totalorder %v496_v0, %v2916_v46  ;;  %vm575_vm10 = vcmp.eq.s32.totalorder %v499_v63, %v2916_v46 }
  0xac   : > { %v2037_v2 = vsel %vm574_vm9, 1.0, %v2736_v49  ;;  %v2038_v5 = vsel %vm575_vm10, 1.0, %v2736_v49 }
  0xad   : > { %2315 = vmatmul.mubr.msk.f32.gmra.mrb[6].mxu0 %vm666_vm0, %v2036_v1 }
  0xae   : > { %v505_v3 = vpop.permute.xlu1 %504  ;;  %2317 = vmatprep.mubr.msk.f32.mxu0 %vm666_vm0, %v2037_v2  ;;  %v502_v4 = vpop.permute.xlu0 %501 }
  0xaf   : > { %vm576_vm11 = vcmp.eq.s32.totalorder %v502_v4, %v2916_v46  ;;  %vm577_vm12 = vcmp.eq.s32.totalorder %v505_v3, %v2916_v46 }
  0xb0   : > { %v2039_v6 = vsel %vm576_vm11, 1.0, %v2736_v49  ;;  %v2040_v9 = vsel %vm577_vm12, 1.0, %v2736_v49 }
  0xb1   : > { %2318 = vmatmul.mubr.msk.f32.gmra.mrb[8].mxu0 %vm666_vm0, %v2038_v5 }
  0xb2   : > { %v511_v7 = vpop.permute.xlu1 %510  ;;  %2320 = vmatprep.mubr.msk.f32.mxu0 %vm666_vm0, %v2039_v6  ;;  %v508_v8 = vpop.permute.xlu0 %507 }
  0xb3   : > { %vm578_vm13 = vcmp.eq.s32.totalorder %v508_v8, %v2916_v46  ;;  %vm579_vm14 = vcmp.eq.s32.totalorder %v511_v7, %v2916_v46 }
  0xb4   : > { %v2041_v10 = vsel %vm578_vm13, 1.0, %v2736_v49  ;;  %v2042_v13 = vsel %vm579_vm14, 1.0, %v2736_v49 }
  0xb5   : > { %2321 = vmatmul.mubr.msk.f32.gmra.mrb[10].mxu0 %vm666_vm0, %v2040_v9 }
  0xb6   : > { %v517_v11 = vpop.permute.xlu1 %516  ;;  %2323 = vmatprep.mubr.msk.f32.mxu0 %vm666_vm0, %v2041_v10  ;;  %v514_v12 = vpop.permute.xlu0 %513 }
  0xb7   : > { %vm580_vm15 = vcmp.eq.s32.totalorder %v514_v12, %v2916_v46  ;;  %vm581_vm1 = vcmp.eq.s32.totalorder %v517_v11, %v2916_v46 }
  0xb8   : > { %v2043_v14 = vsel %vm580_vm15, 1.0, %v2736_v49  ;;  %v2044_v17 = vsel %vm581_vm1, 1.0, %v2736_v49 }
  0xb9   : > { %2324 = vmatmul.mubr.msk.f32.gmra.mrb[12].mxu0 %vm666_vm0, %v2042_v13 }
  0xba   : > { %v523_v15 = vpop.permute.xlu1 %522  ;;  %2326 = vmatprep.mubr.msk.f32.mxu0 %vm666_vm0, %v2043_v14  ;;  %v520_v16 = vpop.permute.xlu0 %519 }
  0xbb   : > { %vm582_vm2 = vcmp.eq.s32.totalorder %v520_v16, %v2916_v46  ;;  %vm583_vm3 = vcmp.eq.s32.totalorder %v523_v15, %v2916_v46 }
  0xbc   : > { %v2045_v18 = vsel %vm582_vm2, 1.0, %v2736_v49  ;;  %v2046_v21 = vsel %vm583_vm3, 1.0, %v2736_v49  ;;  %vm1739_vm3 = vcmask 523264  }
  0xbd   : > { %2327 = vmatmul.mubr.msk.f32.gmra.mrb[14].mxu0 %vm666_vm0, %v2044_v17 }
  0xbe   : > { %v529_v19 = vpop.permute.xlu1 %528  ;;  %2329 = vmatprep.mubr.msk.f32.mxu0 %vm666_vm0, %v2045_v18  ;;  %v526_v20 = vpop.permute.xlu0 %525 }
  0xbf   : > { %vm584_vm4 = vcmp.eq.s32.totalorder %v526_v20, %v2916_v46  ;;  %vm585_vm5 = vcmp.eq.s32.totalorder %v529_v19, %v2916_v46 }
  0xc0   : > { %v2047_v22 = vsel %vm584_vm4, 1.0, %v2736_v49  ;;  %v2048_v25 = vsel %vm585_vm5, 1.0, %v2736_v49 }
  0xc1   : > { %2330 = vmatmul.mubr.msk.f32.gmra.mrb[16].mxu0 %vm666_vm0, %v2046_v21 }
  0xc2   : > { %v535_v23 = vpop.permute.xlu1 %534  ;;  %2332 = vmatprep.mubr.msk.f32.mxu0 %vm666_vm0, %v2047_v22  ;;  %v532_v24 = vpop.permute.xlu0 %531 }
  0xc3   : > { %vm586_vm6 = vcmp.eq.s32.totalorder %v532_v24, %v2916_v46  ;;  %vm587_vm7 = vcmp.eq.s32.totalorder %v535_v23, %v2916_v46 }
  0xc4   : > { %v2049_v26 = vsel %vm586_vm6, 1.0, %v2736_v49  ;;  %v2050_v29 = vsel %vm587_vm7, 1.0, %v2736_v49 }
  0xc5   : > { %2333 = vmatmul.mubr.msk.f32.gmra.mrb[18].mxu0 %vm666_vm0, %v2048_v25 }
  0xc6   : > { %v541_v27 = vpop.permute.xlu1 %540  ;;  %2335 = vmatprep.mubr.msk.f32.mxu0 %vm666_vm0, %v2049_v26  ;;  %v538_v28 = vpop.permute.xlu0 %537 }
  0xc7   : > { %vm588_vm8 = vcmp.eq.s32.totalorder %v538_v28, %v2916_v46  ;;  %vm589_vm9 = vcmp.eq.s32.totalorder %v541_v27, %v2916_v46 }
  0xc8   : > { %v2051_v30 = vsel %vm588_vm8, 1.0, %v2736_v49  ;;  %v2052_v33 = vsel %vm589_vm9, 1.0, %v2736_v49 }
  0xc9   : > { %2336 = vmatmul.mubr.msk.f32.gmra.mrb[20].mxu0 %vm666_vm0, %v2050_v29 }
  0xca   : > { %v547_v31 = vpop.permute.xlu1 %546  ;;  %2338 = vmatprep.mubr.msk.f32.mxu0 %vm666_vm0, %v2051_v30  ;;  %v544_v32 = vpop.permute.xlu0 %543 }
  0xcb   : > { %vm590_vm10 = vcmp.eq.s32.totalorder %v544_v32, %v2916_v46  ;;  %vm591_vm11 = vcmp.eq.s32.totalorder %v547_v31, %v2916_v46 }
  0xcc   : > { %v2053_v34 = vsel %vm590_vm10, 1.0, %v2736_v49  ;;  %v2054_v37 = vsel %vm591_vm11, 1.0, %v2736_v49 }
  0xcd   : > { %2339 = vmatmul.mubr.msk.f32.gmra.mrb[22].mxu0 %vm666_vm0, %v2052_v33 }
  0xce   : > { %v553_v35 = vpop.permute.xlu1 %552  ;;  %2341 = vmatprep.mubr.msk.f32.mxu0 %vm666_vm0, %v2053_v34  ;;  %v550_v36 = vpop.permute.xlu0 %549 }
  0xcf   : > { %vm592_vm12 = vcmp.eq.s32.totalorder %v550_v36, %v2916_v46  ;;  %vm593_vm13 = vcmp.eq.s32.totalorder %v553_v35, %v2916_v46 }
  0xd0   : > { %v2055_v38 = vsel %vm592_vm12, 1.0, %v2736_v49  ;;  %v2056_v41 = vsel %vm593_vm13, 1.0, %v2736_v49 }
  0xd1   : > { %2342 = vmatmul.mubr.msk.f32.gmra.mrb[24].mxu0 %vm666_vm0, %v2054_v37 }
  0xd2   : > { %v559_v39 = vpop.permute.xlu1 %558  ;;  %2344 = vmatprep.mubr.msk.f32.mxu0 %vm666_vm0, %v2055_v38  ;;  %v556_v40 = vpop.permute.xlu0 %555 }
  0xd3   : > { %vm594_vm14 = vcmp.eq.s32.totalorder %v556_v40, %v2916_v46  ;;  %vm595_vm15 = vcmp.eq.s32.totalorder %v559_v39, %v2916_v46  ;;  %v2669_v40 = vld [vmem:[%s3303_s2 + $0x70] sm:$0xff]  }
  0xd4   : > { %v2057_v42 = vsel %vm594_vm14, 1.0, %v2736_v49  ;;  %v2058_v45 = vsel %vm595_vm15, 1.0, %v2736_v49 }
  0xd5   : > { %2345 = vmatmul.mubr.msk.f32.gmra.mrb[26].mxu0 %vm666_vm0, %v2056_v41  ;;  %v2670_v41 = vld [vmem:[%s3303_s2 + $0x78] sm:$0xff]  }
  0xd6   : > { %v565_v43 = vpop.permute.xlu1 %564  ;;  %2347 = vmatprep.mubr.msk.f32.mxu0 %vm666_vm0, %v2057_v42  ;;  %v562_v44 = vpop.permute.xlu0 %561  ;;  %v3047_v42 = vld [vmem:[%s3304_s3] ss:$0 sm:$0xff] }
  0xd7   : > { %vm597_vm1 = vcmp.eq.s32.totalorder %v565_v43, %v2916_v46  ;;  %vm596_vm2 = vcmp.eq.s32.totalorder %v562_v44, %v2916_v46  ;;  %v2662_v46 = vld [vmem:[%s3303_s2 + $0x38] sm:$0xff]  }
  0xd8   : > { %v2060_v47 = vsel %vm597_vm1, 1.0, %v2736_v49  ;;  %v2059_v48 = vsel %vm596_vm2, 1.0, %v2736_v49  ;;  %2367 = vmatprep.subr.bf16.mxu1 %v2662_v46  ;;  %v2663_v49 = vld [vmem:[%s3303_s2 + $0x40] sm:$0xff]  }
  0xd9   : > { %2348 = vmatmul.mubr.msk.f32.gmra.mrb[28].mxu0 %vm666_vm0, %v2058_v45  ;;  %2368 = vmatpush3.bf16.msra.mxu1 %v2662_v46 }
  0xda   : > { %2350 = vmatprep.mubr.msk.f32.mxu0 %vm666_vm0, %v2059_v48  ;;  %2401 = vmatprep.subr.bf16.mxu0 %v2663_v49 }
  0xdb   : > { %2402 = vmatpush3.bf16.msra.mxu0 %v2663_v49 }
  0xdc   : > { %2403 = vmatprep.subr.bf16.mxu0 %v2664_v51 }
  0xdd   : > { %2351 = vmatmul.mubr.msk.f32.gmra.mrb[30].mxu0 %vm666_vm0, %v2060_v47 }
  0xdf   : > { %2404 = vmatpush3.bf16.msra.mxu0 %v2664_v51 }
  0xe0   : > { %2405 = vmatprep.subr.bf16.mxu0 %v2665_v52 }
  0xe3   : > { %2406 = vmatpush3.bf16.msra.mxu0 %v2665_v52 }
  0xe4   : > { %2407 = vmatprep.subr.bf16.mxu0 %v2666_v53 }
  0xe7   : > { %2408 = vmatpush3.bf16.msra.mxu0 %v2666_v53 }
  0xe8   : > { %2409 = vmatprep.subr.bf16.mxu0 %v2667_v54 }
  0xeb   : > { %2410 = vmatpush3.bf16.msra.mxu0 %v2667_v54 }
  0xec   : > { %2411 = vmatprep.subr.bf16.mxu0 %v2668_v55 }
  0xef   : > { %2412 = vmatpush3.bf16.msra.mxu0 %v2668_v55 }
  0xf0   : > { %2413 = vmatprep.subr.bf16.mxu0 %v2669_v40 }
  0xf3   : > { %2414 = vmatpush3.bf16.msra.mxu0 %v2669_v40 }
  0xf4   : > { %2415 = vmatprep.subr.bf16.mxu0 %v2670_v41 }
  0xf7   : > { %2416 = vmatpush3.bf16.msra.mxu0 %v2670_v41 }
 0x174   : > { %v2307_v56 = vpop.f32.mrb[0].mxu0 }
 0x175   : > { %v829_v57 = vpop.f32.mrb[1].mxu0 }
 0x176   : > { %v988_v58 = vpack.c.bf16 %v2307_v56, %v829_v57 }
 0x178   : > { %v2310_v59 = vpop.f32.mrb[2].mxu0  ;;  %2369 = vmatprep.mubr.bf16.mxu1 %v988_v58 }
 0x179   : > { %v839_v60 = vpop.f32.mrb[3].mxu0 }
 0x17a   : > { %v989_v61 = vpack.c.bf16 %v2310_v59, %v839_v60 }
 0x17c   : > { %v2313_v62 = vpop.f32.mrb[4].mxu0  ;;  %2370 = vmatmul.mubr.bf16.vlgmr.msra.gmra.mrb[0].mxu1 %v989_v61 }
 0x17d   : > { %v849_v63 = vpop.f32.mrb[5].mxu0 }
 0x17e   : > { %v990_v0 = vpack.c.bf16 %v2313_v62, %v849_v63 }
 0x180   : > { %v2316_v1 = vpop.f32.mrb[6].mxu0  ;;  %2373 = vmatprep.mubr.bf16.mxu1 %v990_v0 }
 0x181   : > { %v859_v2 = vpop.f32.mrb[7].mxu0 }
 0x182   : > { %v991_v3 = vpack.c.bf16 %v2316_v1, %v859_v2 }
 0x184   : > { %v2319_v4 = vpop.f32.mrb[8].mxu0  ;;  %2374 = vmatmul.mubr.bf16.gmra.mrb[4].mxu1 %v991_v3 }
 0x185   : > { %v869_v5 = vpop.f32.mrb[9].mxu0 }
 0x186   : > { %v992_v6 = vpack.c.bf16 %v2319_v4, %v869_v5 }
 0x188   : > { %v2322_v7 = vpop.f32.mrb[10].mxu0  ;;  %2377 = vmatprep.mubr.bf16.mxu1 %v992_v6 }
 0x189   : > { %v879_v8 = vpop.f32.mrb[11].mxu0 }
 0x18a   : > { %v993_v9 = vpack.c.bf16 %v2322_v7, %v879_v8 }
 0x18c   : > { %v2325_v10 = vpop.f32.mrb[12].mxu0  ;;  %2378 = vmatmul.mubr.bf16.gmra.mrb[8].mxu1 %v993_v9 }
 0x18d   : > { %v889_v11 = vpop.f32.mrb[13].mxu0 }
 0x18e   : > { %v994_v12 = vpack.c.bf16 %v2325_v10, %v889_v11 }
 0x190   : > { %v2328_v13 = vpop.f32.mrb[14].mxu0  ;;  %2381 = vmatprep.mubr.bf16.mxu1 %v994_v12 }
 0x191   : > { %v899_v14 = vpop.f32.mrb[15].mxu0 }
 0x192   : > { %v995_v15 = vpack.c.bf16 %v2328_v13, %v899_v14 }
 0x194   : > { %v2331_v16 = vpop.f32.mrb[16].mxu0  ;;  %2382 = vmatmul.mubr.bf16.gmra.mrb[12].mxu1 %v995_v15 }
 0x195   : > { %v909_v17 = vpop.f32.mrb[17].mxu0 }
 0x196   : > { %v996_v18 = vpack.c.bf16 %v2331_v16, %v909_v17 }
 0x198   : > { %v2334_v19 = vpop.f32.mrb[18].mxu0  ;;  %2385 = vmatprep.mubr.bf16.mxu1 %v996_v18 }
 0x199   : > { %v919_v20 = vpop.f32.mrb[19].mxu0 }
 0x19a   : > { %v997_v21 = vpack.c.bf16 %v2334_v19, %v919_v20 }
 0x19c   : > { %v2337_v22 = vpop.f32.mrb[20].mxu0  ;;  %2386 = vmatmul.mubr.bf16.gmra.mrb[16].mxu1 %v997_v21 }
 0x19d   : > { %v929_v23 = vpop.f32.mrb[21].mxu0 }
 0x19e   : > { %v998_v24 = vpack.c.bf16 %v2337_v22, %v929_v23 }
 0x1a0   : > { %v2340_v25 = vpop.f32.mrb[22].mxu0  ;;  %2389 = vmatprep.mubr.bf16.mxu1 %v998_v24 }
 0x1a1   : > { %v939_v26 = vpop.f32.mrb[23].mxu0 }
 0x1a2   : > { %v999_v27 = vpack.c.bf16 %v2340_v25, %v939_v26 }
 0x1a4   : > { %v2343_v28 = vpop.f32.mrb[24].mxu0  ;;  %2390 = vmatmul.mubr.bf16.gmra.mrb[20].mxu1 %v999_v27 }
 0x1a5   : > { %v949_v29 = vpop.f32.mrb[25].mxu0 }
 0x1a6   : > { %v1000_v30 = vpack.c.bf16 %v2343_v28, %v949_v29 }
 0x1a8   : > { %v2346_v31 = vpop.f32.mrb[26].mxu0  ;;  %2393 = vmatprep.mubr.bf16.mxu1 %v1000_v30 }
 0x1a9   : > { %v959_v32 = vpop.f32.mrb[27].mxu0 }
 0x1aa   : > { %v1001_v33 = vpack.c.bf16 %v2346_v31, %v959_v32 }
 0x1ac   : > { %v2349_v34 = vpop.f32.mrb[28].mxu0  ;;  %2394 = vmatmul.mubr.bf16.gmra.mrb[24].mxu1 %v1001_v33 }
 0x1ad   : > { %v969_v35 = vpop.f32.mrb[29].mxu0 }
 0x1ae   : > { %v1002_v36 = vpack.c.bf16 %v2349_v34, %v969_v35 }
 0x1b0   : > { %v2352_v37 = vpop.f32.mrb[30].mxu0  ;;  %2397 = vmatprep.mubr.bf16.mxu1 %v1002_v36 }
 0x1b1   : > { %v979_v38 = vpop.f32.mrb[31].mxu0 }
 0x1b2   : > { %v1003_v39 = vpack.c.bf16 %v2352_v37, %v979_v38 }
 0x1b4   : > { %2398 = vmatmul.mubr.bf16.gmra.mrb[28].mxu1 %v1003_v39 }
 0x24f   : > { %v2371_v43 = vpop.f32.mrb[0].mxu1 }
 0x250   : > { %v1118_v44 = vadd.f32 %v2371_v43, %v3047_v42  ;;  %v1109_v45 = vpop.f32.mrb[1].mxu1 }
 0x251   : > { %v1110_v47 = vadd.f32 %v3047_v42, %v1109_v45  ;;  %v2372_v48 = vpop.f32.mrb[2].mxu1 }
 0x252   : > { %v1121_v50 = vadd.f32 %v2372_v48, %v3047_v42  ;;  %v1112_v46 = vpop.f32.mrb[3].mxu1  ;;  %v1238_v51 = vmax.f32 %v1118_v44, 0.0 }
 0x253   : > { %v1113_v49 = vadd.f32 %v3047_v42, %v1112_v46  ;;  %v1236_v53 = vmax.f32 %v1110_v47, 0.0 }
 0x254   : > { %v1239_v52 = vmax.f32 %v1121_v50, 0.0 }
 0x255   : > { %v1237_v54 = vmax.f32 %v1113_v49, 0.0 }
 0x256   : > { %v1269_v55 = vpack.c.bf16 %v1239_v52, %v1238_v51 }
 0x257   : > { %v1268_v56 = vpack.c.bf16 %v1237_v54, %v1236_v53  ;;  %v2375_v57 = vpop.f32.mrb[4].mxu1 }
 0x258   : > { %v1134_v58 = vadd.f32 %v2375_v57, %v3047_v42  ;;  %v1125_v59 = vpop.f32.mrb[5].mxu1 }
 0x259   : > { %v1126_v60 = vadd.f32 %v3047_v42, %v1125_v59  ;;  %v2376_v61 = vpop.f32.mrb[6].mxu1  ;;  %2417 = vmatprep.mubr.bf16.mxu0 %v1268_v56 }
 0x25a   : > { %v1137_v62 = vadd.f32 %v2376_v61, %v3047_v42  ;;  %v1128_v63 = vpop.f32.mrb[7].mxu1  ;;  %2418 = vmatmul.mubr.bf16.vlgmr.msra.gmra.mrb[32].mxu0 %v1269_v55  ;;  %v1242_v1 = vmax.f32 %v1134_v58, 0.0 }
 0x25b   : > { %v1129_v0 = vadd.f32 %v3047_v42, %v1128_v63  ;;  %v1240_v3 = vmax.f32 %v1126_v60, 0.0 }
 0x25c   : > { %v1243_v2 = vmax.f32 %v1137_v62, 0.0 }
 0x25d   : > { %v1241_v4 = vmax.f32 %v1129_v0, 0.0 }
 0x25e   : > { %v1271_v5 = vpack.c.bf16 %v1243_v2, %v1242_v1 }
 0x25f   : > { %v1270_v6 = vpack.c.bf16 %v1241_v4, %v1240_v3  ;;  %v2379_v7 = vpop.f32.mrb[8].mxu1 }
 0x260   : > { %v1150_v8 = vadd.f32 %v2379_v7, %v3047_v42  ;;  %v1141_v9 = vpop.f32.mrb[9].mxu1 }
 0x261   : > { %v1142_v10 = vadd.f32 %v3047_v42, %v1141_v9  ;;  %v2380_v11 = vpop.f32.mrb[10].mxu1  ;;  %2421 = vmatprep.mubr.bf16.mxu0 %v1270_v6 }
 0x262   : > { %v1153_v12 = vadd.f32 %v2380_v11, %v3047_v42  ;;  %v1144_v13 = vpop.f32.mrb[11].mxu1  ;;  %2422 = vmatmul.mubr.bf16.gmra.mrb[36].mxu0 %v1271_v5  ;;  %v1246_v15 = vmax.f32 %v1150_v8, 0.0 }
 0x263   : > { %v1145_v14 = vadd.f32 %v3047_v42, %v1144_v13  ;;  %v1244_v17 = vmax.f32 %v1142_v10, 0.0 }
 0x264   : > { %v1247_v16 = vmax.f32 %v1153_v12, 0.0 }
 0x265   : > { %v1245_v18 = vmax.f32 %v1145_v14, 0.0 }
 0x266   : > { %v1273_v19 = vpack.c.bf16 %v1247_v16, %v1246_v15 }
 0x267   : > { %v1272_v20 = vpack.c.bf16 %v1245_v18, %v1244_v17  ;;  %v2383_v21 = vpop.f32.mrb[12].mxu1 }
 0x268   : > { %v1166_v22 = vadd.f32 %v2383_v21, %v3047_v42  ;;  %v1157_v23 = vpop.f32.mrb[13].mxu1 }
 0x269   : > { %v1158_v24 = vadd.f32 %v3047_v42, %v1157_v23  ;;  %v2384_v25 = vpop.f32.mrb[14].mxu1  ;;  %2425 = vmatprep.mubr.bf16.mxu0 %v1272_v20 }
 0x26a   : > { %v1169_v26 = vadd.f32 %v2384_v25, %v3047_v42  ;;  %v1160_v27 = vpop.f32.mrb[15].mxu1  ;;  %2426 = vmatmul.mubr.bf16.gmra.mrb[40].mxu0 %v1273_v19  ;;  %v1250_v29 = vmax.f32 %v1166_v22, 0.0 }
 0x26b   : > { %v1161_v28 = vadd.f32 %v3047_v42, %v1160_v27  ;;  %v1248_v31 = vmax.f32 %v1158_v24, 0.0 }
 0x26c   : > { %v1251_v30 = vmax.f32 %v1169_v26, 0.0 }
 0x26d   : > { %v1249_v32 = vmax.f32 %v1161_v28, 0.0  ;;  %v3094_v28 = vld [vmem:[%s3304_s3 + $0x1] ss:$0 sm:$0xff] }
 0x26e   : > { %v1275_v33 = vpack.c.bf16 %v1251_v30, %v1250_v29 }
 0x26f   : > { %v1274_v34 = vpack.c.bf16 %v1249_v32, %v1248_v31  ;;  %v2387_v35 = vpop.f32.mrb[16].mxu1 }
 0x270   : > { %v1182_v36 = vadd.f32 %v2387_v35, %v3047_v42  ;;  %v1173_v37 = vpop.f32.mrb[17].mxu1 }
 0x271   : > { %v1174_v38 = vadd.f32 %v3047_v42, %v1173_v37  ;;  %v2388_v39 = vpop.f32.mrb[18].mxu1  ;;  %2429 = vmatprep.mubr.bf16.mxu0 %v1274_v34 }
 0x272   : > { %v1185_v40 = vadd.f32 %v2388_v39, %v3047_v42  ;;  %v1176_v41 = vpop.f32.mrb[19].mxu1  ;;  %2430 = vmatmul.mubr.bf16.gmra.mrb[44].mxu0 %v1275_v33  ;;  %v1254_v44 = vmax.f32 %v1182_v36, 0.0 }
 0x273   : > { %v1177_v43 = vadd.f32 %v3047_v42, %v1176_v41  ;;  %v1252_v47 = vmax.f32 %v1174_v38, 0.0 }
 0x274   : > { %v1255_v45 = vmax.f32 %v1185_v40, 0.0 }
 0x275   : > { %v1253_v48 = vmax.f32 %v1177_v43, 0.0 }
 0x276   : > { %v1277_v50 = vpack.c.bf16 %v1255_v45, %v1254_v44 }
 0x277   : > { %v1276_v46 = vpack.c.bf16 %v1253_v48, %v1252_v47  ;;  %v2391_v49 = vpop.f32.mrb[20].mxu1 }
 0x278   : > { %v1198_v51 = vadd.f32 %v2391_v49, %v3047_v42  ;;  %v1189_v52 = vpop.f32.mrb[21].mxu1 }
 0x279   : > { %v1190_v53 = vadd.f32 %v3047_v42, %v1189_v52  ;;  %v2392_v54 = vpop.f32.mrb[22].mxu1  ;;  %2433 = vmatprep.mubr.bf16.mxu0 %v1276_v46 }
 0x27a   : > { %v1201_v55 = vadd.f32 %v2392_v54, %v3047_v42  ;;  %v1192_v56 = vpop.f32.mrb[23].mxu1  ;;  %2434 = vmatmul.mubr.bf16.gmra.mrb[48].mxu0 %v1277_v50  ;;  %v1258_v58 = vmax.f32 %v1198_v51, 0.0 }
 0x27b   : > { %v1193_v57 = vadd.f32 %v3047_v42, %v1192_v56  ;;  %v1256_v60 = vmax.f32 %v1190_v53, 0.0 }
 0x27c   : > { %v1259_v59 = vmax.f32 %v1201_v55, 0.0 }
 0x27d   : > { %v1257_v61 = vmax.f32 %v1193_v57, 0.0 }
 0x27e   : > { %v1279_v62 = vpack.c.bf16 %v1259_v59, %v1258_v58 }
 0x27f   : > { %v1278_v63 = vpack.c.bf16 %v1257_v61, %v1256_v60  ;;  %v2395_v0 = vpop.f32.mrb[24].mxu1 }
 0x280   : > { %v1214_v1 = vadd.f32 %v2395_v0, %v3047_v42  ;;  %v1205_v2 = vpop.f32.mrb[25].mxu1 }
 0x281   : > { %v1206_v3 = vadd.f32 %v3047_v42, %v1205_v2  ;;  %v2396_v4 = vpop.f32.mrb[26].mxu1  ;;  %2437 = vmatprep.mubr.bf16.mxu0 %v1278_v63 }
 0x282   : > { %v1217_v5 = vadd.f32 %v2396_v4, %v3047_v42  ;;  %v1208_v6 = vpop.f32.mrb[27].mxu1  ;;  %2438 = vmatmul.mubr.bf16.gmra.mrb[52].mxu0 %v1279_v62  ;;  %v1262_v8 = vmax.f32 %v1214_v1, 0.0 }
 0x283   : > { %v1209_v7 = vadd.f32 %v3047_v42, %v1208_v6  ;;  %v1260_v10 = vmax.f32 %v1206_v3, 0.0 }
 0x284   : > { %v1263_v9 = vmax.f32 %v1217_v5, 0.0 }
 0x285   : > { %v1261_v11 = vmax.f32 %v1209_v7, 0.0 }
 0x286   : > { %v1281_v12 = vpack.c.bf16 %v1263_v9, %v1262_v8 }
 0x287   : > { %v1280_v13 = vpack.c.bf16 %v1261_v11, %v1260_v10  ;;  %v2399_v14 = vpop.f32.mrb[28].mxu1 }
 0x288   : > { %v1230_v15 = vadd.f32 %v2399_v14, %v3047_v42  ;;  %v1221_v16 = vpop.f32.mrb[29].mxu1 }
 0x289   : > { %v1222_v17 = vadd.f32 %v3047_v42, %v1221_v16  ;;  %v2400_v18 = vpop.f32.mrb[30].mxu1  ;;  %2441 = vmatprep.mubr.bf16.mxu0 %v1280_v13 }
 0x28a   : > { %v1233_v19 = vadd.f32 %v2400_v18, %v3047_v42  ;;  %v1224_v20 = vpop.f32.mrb[31].mxu1  ;;  %2442 = vmatmul.mubr.bf16.gmra.mrb[56].mxu0 %v1281_v12  ;;  %v1266_v22 = vmax.f32 %v1230_v15, 0.0 }
 0x28b   : > { %v1225_v21 = vadd.f32 %v3047_v42, %v1224_v20  ;;  %v1264_v24 = vmax.f32 %v1222_v17, 0.0  ;;  %v1551_v42 = vld [vmem:[%s3088_s30 + $0x8] sm:$0xff] }
 0x28c   : > { %v1267_v23 = vmax.f32 %v1233_v19, 0.0  ;;  %1618 = vmatprep.mubr.f32.mxu1 %v1551_v42 }
 0x28d   : > { %v1265_v25 = vmax.f32 %v1225_v21, 0.0 }
 0x28e   : > { %v1283_v26 = vpack.c.bf16 %v1267_v23, %v1266_v22 }
 0x28f   : > { %v1282_v27 = vpack.c.bf16 %v1265_v25, %v1264_v24 }
 0x291   : > { %2445 = vmatprep.mubr.bf16.mxu0 %v1282_v27 }
 0x292   : > { %2446 = vmatmul.mubr.bf16.gmra.mrb[60].mxu0 %v1283_v26 }
 0x32d   : > { %v2419_v29 = vpop.f32.mrb[32].mxu0 }
 0x32e   : > { %v1400_v30 = vadd.f32 %v2419_v29, %v3094_v28  ;;  %v1391_v31 = vpop.f32.mrb[33].mxu0 }
 0x32f   : > { %v1392_v32 = vadd.f32 %v3094_v28, %v1391_v31  ;;  %v2420_v33 = vpop.f32.mrb[34].mxu0 }
 0x330   : > { %v1403_v34 = vadd.f32 %v2420_v33, %v3094_v28  ;;  %v1394_v35 = vpop.f32.mrb[35].mxu0  ;;  %v1520_v37 = vmax.f32 %v1400_v30, 0.0 }
 0x331   : > { %v1395_v36 = vadd.f32 %v3094_v28, %v1394_v35  ;;  %v1518_v39 = vmax.f32 %v1392_v32, 0.0 }
 0x332   : > { %v1521_v38 = vmax.f32 %v1403_v34, 0.0 }
 0x333   : > { %v1519_v40 = vmax.f32 %v1395_v36, 0.0 }
 0x334   : > { %v3100_v41 = vpack.c.bf16 %v1521_v38, %v1520_v37 }
 0x335   : > { %v3102_v43 = vpack.c.bf16 %v1519_v40, %v1518_v39  ;;  %v2423_v44 = vpop.f32.mrb[36].mxu0 }
 0x336   : > { %v1416_v45 = vadd.f32 %v2423_v44, %v3094_v28  ;;  %v1407_v47 = vpop.f32.mrb[37].mxu0 }
 0x337   : > { %v1408_v48 = vadd.f32 %v3094_v28, %v1407_v47  ;;  %v2424_v50 = vpop.f32.mrb[38].mxu0 }
 0x338   : > { %v1419_v46 = vadd.f32 %v2424_v50, %v3094_v28  ;;  %v1410_v49 = vpop.f32.mrb[39].mxu0  ;;  %v1524_v52 = vmax.f32 %v1416_v45, 0.0 }
 0x339   : > { %v1411_v51 = vadd.f32 %v3094_v28, %v1410_v49  ;;  %v1522_v54 = vmax.f32 %v1408_v48, 0.0 }
 0x33a   : > { %v1525_v53 = vmax.f32 %v1419_v46, 0.0 }
 0x33b   : > { %v1523_v55 = vmax.f32 %v1411_v51, 0.0 }
 0x33c   : > { %v3108_v56 = vpack.c.bf16 %v1525_v53, %v1524_v52 }
 0x33d   : > { %v3110_v57 = vpack.c.bf16 %v1523_v55, %v1522_v54  ;;  %v2427_v58 = vpop.f32.mrb[40].mxu0 }
 0x33e   : > { %v1432_v59 = vadd.f32 %v2427_v58, %v3094_v28  ;;  %v1423_v60 = vpop.f32.mrb[41].mxu0 }
 0x33f   : > { %v1424_v61 = vadd.f32 %v3094_v28, %v1423_v60  ;;  %v2428_v62 = vpop.f32.mrb[42].mxu0 }
 0x340   : > { %v1435_v63 = vadd.f32 %v2428_v62, %v3094_v28  ;;  %v1426_v0 = vpop.f32.mrb[43].mxu0  ;;  %v1528_v2 = vmax.f32 %v1432_v59, 0.0 }
 0x341   : > { %v1427_v1 = vadd.f32 %v3094_v28, %v1426_v0  ;;  %v1526_v4 = vmax.f32 %v1424_v61, 0.0 }
 0x342   : > { %v1529_v3 = vmax.f32 %v1435_v63, 0.0 }
 0x343   : > { %v1527_v5 = vmax.f32 %v1427_v1, 0.0 }
 0x344   : > { %v3116_v6 = vpack.c.bf16 %v1529_v3, %v1528_v2 }
 0x345   : > { %v3118_v7 = vpack.c.bf16 %v1527_v5, %v1526_v4  ;;  %v2431_v8 = vpop.f32.mrb[44].mxu0 }
 0x346   : > { %v1448_v9 = vadd.f32 %v2431_v8, %v3094_v28  ;;  %v1439_v10 = vpop.f32.mrb[45].mxu0 }
 0x347   : > { %v1440_v11 = vadd.f32 %v3094_v28, %v1439_v10  ;;  %v2432_v12 = vpop.f32.mrb[46].mxu0 }
 0x348   : > { %v1451_v13 = vadd.f32 %v2432_v12, %v3094_v28  ;;  %v1442_v14 = vpop.f32.mrb[47].mxu0  ;;  %v1532_v16 = vmax.f32 %v1448_v9, 0.0 }
 0x349   : > { %v1443_v15 = vadd.f32 %v3094_v28, %v1442_v14  ;;  %v1530_v18 = vmax.f32 %v1440_v11, 0.0 }
 0x34a   : > { %v1533_v17 = vmax.f32 %v1451_v13, 0.0 }
 0x34b   : > { %v1531_v19 = vmax.f32 %v1443_v15, 0.0 }
 0x34c   : > { %v3124_v20 = vpack.c.bf16 %v1533_v17, %v1532_v16  ;;  %v1629_v17 = vld [vmem:[%s3306_s5] sm:$0xff] }
 0x34d   : > { %v3126_v21 = vpack.c.bf16 %v1531_v19, %v1530_v18  ;;  %v2435_v22 = vpop.f32.mrb[48].mxu0  ;;  %v1631_v18 = vld [vmem:[%s3306_s5 + $0x10] sm:$0xff]  ;;  %v1550_v19 = vld [vmem:[%s3088_s30] sm:$0xff] }
 0x34e   : > { %v1464_v23 = vadd.f32 %v2435_v22, %v3094_v28  ;;  %v1455_v24 = vpop.f32.mrb[49].mxu0  ;;  %v1553_v22 = vld [vmem:[%s3088_s30 + $0x18] sm:$0xff] }
 0x34f   : > { %v1456_v25 = vadd.f32 %v3094_v28, %v1455_v24  ;;  %v2436_v26 = vpop.f32.mrb[50].mxu0  ;;  %v1634_v24 = vld [vmem:[%s3306_s5 + $0x28] sm:$0xff] }
 0x350   : > { %v1467_v27 = vadd.f32 %v2436_v26, %v3094_v28  ;;  %v1458_v42 = vpop.f32.mrb[51].mxu0  ;;  %v1536_v30 = vmax.f32 %v1464_v23, 0.0 }
 0x351   : > { %v1459_v29 = vadd.f32 %v3094_v28, %v1458_v42  ;;  %v1534_v32 = vmax.f32 %v1456_v25, 0.0  ;;  %v1552_v25 = vld [vmem:[%s3088_s30 + $0x10] sm:$0xff]  ;;  %s2140_s30 = sshll.u32 %s2821_s21, 8  ;;  %s2737_s21 = smov [#allocation2]  }
 0x352   : > { %v1537_v31 = vmax.f32 %v1467_v27, 0.0  ;;  %v1636_v27 = vld [vmem:[%s3306_s5 + $0x38] sm:$0xff]  ;;  %s3258_s25 = scalar_lea.hbm %s3312_s11, %s2140_s30  ;;  %s2675_s13 = sshll.u32 %s2737_s21, 4  ;;  %s2676_s13 = int_to_ptr.vmem [resolvable:$false] %s2675_s13 }
 0x353   : > { %v1535_v33 = vmax.f32 %v1459_v29, 0.0  ;;  %v1637_v29 = vld [vmem:[%s3306_s5 + $0x40] sm:$0xff]  ;;  %s2677_s0 = scalar_lea.vmem %s2676_s13, 512 }
 0x354   : > { %v2526_v34 = vpack.c.bf16 %v1537_v31, %v1536_v30  ;;  %v1638_v30 = vld [vmem:[%s3306_s5 + $0x48] sm:$0xff] }
 0x355   : > { %v2522_v35 = vpack.c.bf16 %v1535_v33, %v1534_v32  ;;  %v2439_v36 = vpop.f32.mrb[52].mxu0  ;;  %v2570_v31 = vpack.c.bf16 %v1638_v30, %v1637_v29  ;;  %v1639_v32 = vld [vmem:[%s3306_s5 + $0x50] sm:$0xff]  ;;  %v1640_v33 = vld [vmem:[%s3306_s5 + $0x58] sm:$0xff] }
 0x356   : > { %v1480_v37 = vadd.f32 %v2439_v36, %v3094_v28  ;;  %v1471_v38 = vpop.f32.mrb[53].mxu0  ;;  %v1642_v36 = vld [vmem:[%s3306_s5 + $0x68] sm:$0xff] }
 0x357   : > { %v1472_v39 = vadd.f32 %v3094_v28, %v1471_v38  ;;  %v2440_v40 = vpop.f32.mrb[54].mxu0  ;;  %2523 = vmatprep.subr.bf16.mxu1 %v2522_v35  ;;  %v1641_v35 = vld [vmem:[%s3306_s5 + $0x60] sm:$0xff]  ;;  %v1643_v38 = vld [vmem:[%s3306_s5 + $0x70] sm:$0xff] }
 0x358   : > { %v1483_v44 = vadd.f32 %v2440_v40, %v3094_v28  ;;  %v1474_v45 = vpop.f32.mrb[55].mxu0  ;;  %2525 = vmatpush3.bf16.msra.mxu1 %v3102_v43  ;;  %v1540_v48 = vmax.f32 %v1480_v37, 0.0  ;;  %v2578_v37 = vpack.c.bf16 %v1642_v36, %v1641_v35 }
 0x359   : > { %v1475_v47 = vadd.f32 %v3094_v28, %v1474_v45  ;;  %2527 = vmatprep.subr.bf16.mxu1 %v2526_v34  ;;  %v1538_v46 = vmax.f32 %v1472_v39, 0.0  ;;  %v2574_v34 = vpack.c.bf16 %v1640_v33, %v1639_v32  ;;  %v1644_v39 = vld [vmem:[%s3306_s5 + $0x78] sm:$0xff]  ;;  %v1725_v45 = vld [vmem:[%s3308_s7 + $0x8] sm:$0xff] }
 0x35a   : > { %v1541_v50 = vmax.f32 %v1483_v44, 0.0  ;;  %v2582_v40 = vpack.c.bf16 %v1644_v39, %v1643_v38  ;;  %v1724_v44 = vld [vmem:[%s3308_s7] sm:$0xff] }
 0x35b   : > { %v1539_v49 = vmax.f32 %v1475_v47, 0.0  ;;  %v1726_v47 = vld [vmem:[%s3308_s7 + $0x10] sm:$0xff] }
 0x35c   : > { %v2534_v51 = vpack.c.bf16 %v1541_v50, %v1540_v48  ;;  %2529 = vmatpush3.bf16.msra.mxu1 %v3100_v41  ;;  %v2586_v48 = vpack.c.bf16 %v1725_v45, %v1724_v44  ;;  %v1727_v50 = vld [vmem:[%s3308_s7 + $0x18] sm:$0xff] }
 0x35d   : > { %v2530_v52 = vpack.c.bf16 %v1539_v49, %v1538_v46  ;;  %v2443_v53 = vpop.f32.mrb[56].mxu0  ;;  %v2590_v46 = vpack.c.bf16 %v1727_v50, %v1726_v47  ;;  %v1728_v49 = vld [vmem:[%s3308_s7 + $0x20] sm:$0xff] }
 0x35e   : > { %v1496_v54 = vadd.f32 %v2443_v53, %v3094_v28  ;;  %v1487_v55 = vpop.f32.mrb[57].mxu0  ;;  %2587 = vmatprep.subr.bf16.mxu0 %v2586_v48  ;;  %v1730_v53 = vld [vmem:[%s3308_s7 + $0x30] sm:$0xff] }
 0x35f   : > { %v1488_v58 = vadd.f32 %v3094_v28, %v1487_v55  ;;  %v2444_v59 = vpop.f32.mrb[58].mxu0  ;;  %2531 = vmatprep.subr.bf16.mxu1 %v2530_v52  ;;  %2589 = vmatpush3.bf16.msra.mxu0 %v2586_v48 }
 0x360   : > { %v1499_v43 = vadd.f32 %v2444_v59, %v3094_v28  ;;  %v1490_v60 = vpop.f32.mrb[59].mxu0  ;;  %2533 = vmatpush3.bf16.msra.mxu1 %v3110_v57  ;;  %v1544_v62 = vmax.f32 %v1496_v54, 0.0  ;;  %2591 = vmatprep.subr.bf16.mxu0 %v2590_v46  ;;  %v1731_v54 = vld [vmem:[%s3308_s7 + $0x38] sm:$0xff] }
 0x361   : > { %v1491_v61 = vadd.f32 %v3094_v28, %v1490_v60  ;;  %2535 = vmatprep.subr.bf16.mxu1 %v2534_v51  ;;  %v1542_v41 = vmax.f32 %v1488_v58, 0.0  ;;  %v1729_v51 = vld [vmem:[%s3308_s7 + $0x28] sm:$0xff]  ;;  %v2598_v55 = vpack.c.bf16 %v1731_v54, %v1730_v53 }
 0x362   : > { %v1545_v63 = vmax.f32 %v1499_v43, 0.0  ;;  %v2594_v52 = vpack.c.bf16 %v1729_v51, %v1728_v49 }
 0x363   : > { %v1543_v0 = vmax.f32 %v1491_v61, 0.0  ;;  %2593 = vmatpush3.bf16.msra.mxu0 %v2590_v46 }
 0x364   : > { %v2542_v1 = vpack.c.bf16 %v1545_v63, %v1544_v62  ;;  %2537 = vmatpush3.bf16.msra.mxu1 %v3108_v56  ;;  %2595 = vmatprep.subr.bf16.mxu0 %v2594_v52  ;;  %v1823_v63 = vld [vmem:[%s3310_s9] sm:$0xff] }
 0x365   : > { %v2538_v2 = vpack.c.bf16 %v1543_v0, %v1542_v41  ;;  %v2447_v3 = vpop.f32.mrb[60].mxu0  ;;  %v1824_v41 = vld [vmem:[%s3310_s9 + $0x8] sm:$0xff] }
 0x366   : > { %v1512_v4 = vadd.f32 %v2447_v3, %v3094_v28  ;;  %v1503_v5 = vpop.f32.mrb[61].mxu0  ;;  %v2602_v0 = vpack.c.bf16 %v1824_v41, %v1823_v63 }
 0x367   : > { %v1504_v8 = vadd.f32 %v3094_v28, %v1503_v5  ;;  %v2448_v9 = vpop.f32.mrb[62].mxu0  ;;  %2539 = vmatprep.subr.bf16.mxu1 %v2538_v2  ;;  %2597 = vmatpush3.bf16.msra.mxu0 %v2594_v52  ;;  %v1645_v2 = vld [vmem:[%s432_s14] sm:$0xff] }
 0x368   : > { %v1515_v57 = vadd.f32 %v2448_v9, %v3094_v28  ;;  %v1506_v10 = vpop.f32.mrb[63].mxu0  ;;  %2541 = vmatpush3.bf16.msra.mxu1 %v3118_v7  ;;  %v1548_v12 = vmax.f32 %v1512_v4, 0.0  ;;  %v1630_v7 = vld [vmem:[%s3306_s5 + $0x8] sm:$0xff]  ;;  %2599 = vmatprep.subr.bf16.mxu0 %v2598_v55 }
 0x369   : > { %v1507_v11 = vadd.f32 %v3094_v28, %v1506_v10  ;;  %2543 = vmatprep.subr.bf16.mxu1 %v2542_v1  ;;  %v1546_v13 = vmax.f32 %v1504_v8, 0.0  ;;  %v2554_v28 = vpack.c.bf16 %v1630_v7, %v1629_v17  ;;  %v1646_v1 = vld [vmem:[%s432_s14 + $0x8] sm:$0xff]  ;;  %v1825_v10 = vld [vmem:[%s3310_s9 + $0x10] sm:$0xff]  ;;  %s414_s14 = scalar_lea.vmem [#allocation2], %s2021_s12 }
 0x36a   : > { %v1549_v56 = vmax.f32 %v1515_v57, 0.0  ;;  %s1931_s15 = sshll.u32 %s414_s14, 4  ;;  %s3253_s15 = int_to_ptr.vmem [resolvable:$true] %s1931_s15 }
 0x36b   : > { %v1547_v14 = vmax.f32 %v1507_v11, 0.0  ;;  %2601 = vmatpush3.bf16.msra.mxu0 %v2598_v55  ;;  %v1826_v11 = vld [vmem:[%s3310_s9 + $0x18] sm:$0xff]  ;;  %s2671_s12 = scalar_lea.vmem %s3253_s15, 256  ;;  %p2678_p1 = scmp.lt.s32.totalorder %s3253_s15, %s2676_s13 }
 0x36c   : > { %v2550_v15 = vpack.c.bf16 %v1549_v56, %v1548_v12  ;;  %2545 = vmatpush3.bf16.msra.mxu1 %v3116_v6  ;;  %v1632_v6 = vld [vmem:[%s3306_s5 + $0x18] sm:$0xff]  ;;  %v2606_v12 = vpack.c.bf16 %v1826_v11, %v1825_v10  ;;  %v2128_v56 = vld [vmem:[%s3309_s8] ss:$0 sm:$0xff]  ;;  %p2672_p12 = scmp.ne.s32.totalorder %s3253_s15, %s2671_s12  ;;  %p2679_p2 = scmp.lt.s32.totalorder %s2677_s0, %s2671_s12 }
 0x36d   : > { %v2546_v16 = vpack.c.bf16 %v1547_v14, %v1546_v13  ;;  %v2558_v23 = vpack.c.bf16 %v1632_v6, %v1631_v18 }
 0x36e   : > { %p2673_p13 = pnand %p2672_p12, %p2838_p5  ;;  %p2680_p3 = por %p2679_p2, %p2678_p1 }
 0x36f   : > { %2547 = vmatprep.subr.bf16.mxu1 %v2546_v16 }
 0x370   : > { %2549 = vmatpush3.bf16.msra.mxu1 %v3126_v21  ;;  %v1633_v21 = vld [vmem:[%s3306_s5 + $0x20] sm:$0xff]  ;;  %p2674_p0 = pneg %p2673_p13 }
 0x371   : > { %2551 = vmatprep.subr.bf16.mxu1 %v2550_v15  ;;  %v2562_v26 = vpack.c.bf16 %v1634_v24, %v1633_v21 }
 0x372   : > { %p2681_p4 = pnand %p2680_p3, %p2674_p0 }
 0x374   : > { %2553 = vmatpush3.bf16.msra.mxu1 %v3124_v20  ;;  %v1635_v20 = vld [vmem:[%s3306_s5 + $0x30] sm:$0xff] }
 0x375   : > { %2555 = vmatprep.subr.bf16.mxu1 %v2554_v28  ;;  %v2566_v42 = vpack.c.bf16 %v1636_v27, %v1635_v20 }
 0x377   : > { %1619 = vmatmul.mubr.f32.vlgmr.msra.gmra.mrb[32].mxu1 %v1550_v19 }
 0x378   : > { %1623 = vmatprep.mubr.f32.mxu1 %v1553_v22  ;;  %2557 = vmatpush3.bf16.msra.mxu1 %v2554_v28  ;;  %v2131_v28 = vld [vmem:[%s3311_s10] ss:$0 sm:$0xff] }
 0x379   : > { %2559 = vmatprep.subr.bf16.mxu1 %v2558_v23 }
 0x37b   : > { %1624 = vmatmul.mubr.f32.gmra.mrb[34].mxu1 %v1552_v25 }
 0x37c   : > { %2561 = vmatpush3.bf16.msra.mxu1 %v2558_v23 }
 0x37d   : > { %2563 = vmatprep.subr.bf16.mxu1 %v2562_v26 }
 0x380   : > { %2565 = vmatpush3.bf16.msra.mxu1 %v2562_v26 }
 0x381   : > { %2567 = vmatprep.subr.bf16.mxu1 %v2566_v42 }
 0x384   : > { %2569 = vmatpush3.bf16.msra.mxu1 %v2566_v42 }
 0x385   : > { %2571 = vmatprep.subr.bf16.mxu1 %v2570_v31 }
 0x388   : > { %2573 = vmatpush3.bf16.msra.mxu1 %v2570_v31 }
 0x389   : > { %2575 = vmatprep.subr.bf16.mxu1 %v2574_v34 }
 0x38c   : > { %2577 = vmatpush3.bf16.msra.mxu1 %v2574_v34 }
 0x38d   : > { %2579 = vmatprep.subr.bf16.mxu1 %v2578_v37 }
 0x390   : > { %2581 = vmatpush3.bf16.msra.mxu1 %v2578_v37 }
 0x391   : > { %2583 = vmatprep.subr.bf16.mxu1 %v2582_v40 }
 0x394   : > { %2585 = vmatpush3.bf16.msra.mxu1 %v2582_v40 }
 0x395   : > { %2603 = vmatprep.subr.bf16.mxu1 %v2602_v0 }
 0x44a   : > { %v2257_v58 = vpop.f32.mrb[32].mxu1 }
 0x44b   : > { %v2258_v59 = vpop.f32.mrb[33].mxu1 }
 0x44c   : > { %v2259_v43 = vadd.f32 %v2258_v59, %v2257_v58 }
 0x44e   : > { %v2260_v60 = vpop.f32.mrb[34].mxu1  ;;  %2481 = vmatprep.mubr.f32.mxu1 %v2259_v43 }
 0x44f   : > { %v2261_v61 = vpop.f32.mrb[35].mxu1 }
 0x450   : > { %v2262_v62 = vadd.f32 %v2261_v61, %v2260_v60 }
 0x452   : > { %2482 = vmatmul.mubr.f32.vlgmr.msra.gmra.mrb[36].mxu1 %v2262_v62 }
 0x453   : > { %2605 = vmatpush3.bf16.msra.mxu1 %v2602_v0 }
 0x454   : > { %2607 = vmatprep.subr.bf16.mxu1 %v2606_v12 }
 0x457   : > { %2609 = vmatpush3.bf16.msra.mxu1 %v2606_v12 }
 0x525   : > { %v2483_v3 = vpop.f32.mrb[36].mxu1 }
 0x526   : > { %v1719_v4 = vadd.f32 %v2483_v3, %v1646_v1  ;;  %v1713_v5 = vpop.f32.mrb[37].mxu1 }
 0x527   : > { %v1714_v8 = vadd.f32 %v1713_v5, %v1645_v2 }
 0x528   : > { %v1723_v57 = vmax.f32 %v1719_v4, 0.0 }
 0x529   : > { %v1722_v9 = vmax.f32 %v1714_v8, 0.0 }
 0x52b   : > { %2500 = vmatprep.mubr.msk.f32.mxu0 %vm1739_vm3, %v1722_v9 }
 0x52c   : > { %2501 = vmatmul.mubr.msk.f32.vlgmr.msra.gmra.mrb[64].mxu0 %vm1739_vm3, %v1723_v57 }
 0x5ff   : > { %v2502_v13 = vpop.f32.mrb[64].mxu0 }
 0x600   : > { %v1818_v14 = vadd.f32 %v2502_v13, %v2128_v56  ;;  %v1812_v15 = vpop.f32.mrb[65].mxu0 }
 0x601   : > { %v1813_v16 = vadd.f32 %v2128_v56, %v1812_v15 }
 0x602   : > { %v1822_v7 = vmax.f32 %v1818_v14, 0.0 }
 0x603   : > { %v1821_v17 = vmax.f32 %v1813_v16, 0.0 }
 0x605   : > { %2511 = vmatprep.mubr.msk.f32.mxu1 %vm666_vm0, %v1821_v17 }
 0x606   : > { %2512 = vmatmul.mubr.msk.f32.vlgmr.msra.gmra.mrb[38].mxu1 %vm666_vm0, %v1822_v7 }
 0x6d9   : > { %v2513_v18 = vpop.f32.mrb[38].mxu1 }
 0x6da   : > { %v1912_v6 = vadd.f32 %v2513_v18, %v2131_v28  ;;  %v1906_v19 = vpop.f32.mrb[39].mxu1 }
 0x6db   : > { %v1907_v22 = vadd.f32 %v2131_v28, %v1906_v19 }
 0x6dc   : > { %1916 = vst [vmem:[%s414_s14 + $0x8] sm:$0xff] %v1912_v6 }
 0x6dd   : > { %1915 = vst [vmem:[%s414_s14] sm:$0xff] %v1907_v22 }
 0x6de   : > { %2684 = shalt.err (!%p2681_p4)
}
 0x6df   : > { %s2685_s29 = scalar_lea.hbm %s3258_s25, 256  ;;  %s2689_s22 = scalar_lea.hbm %s3312_s11, 512 }
 0x6e0   : > { %p2686_p7 = scmp.ne.s32.totalorder %s3258_s25, %s2685_s29  ;;  %p2690_p10 = scmp.lt.u32.totalorder %s3258_s25, %s3312_s11 }
 0x6e1   : > { %p2691_p11 = scmp.lt.u32.totalorder %s2689_s22, %s2685_s29  ;;  %p2693_p13 = scmp.lt.u32.totalorder %s2685_s29, %s3258_s25 }
 0x6e2   : > { %p2687_p8 = pnand %p2686_p7, %p2838_p5 }
 0x6e3   : > { %p2692_p12 = por %p2691_p11, %p2690_p10 }
 0x6e4   : > { %p2688_p9 = pneg %p2687_p8 }
 0x6e5   : > { %p2694_p0 = por %p2693_p13, %p2692_p12 }
 0x6e7   : > { %p2695_p1 = pnand %p2694_p0, %p2688_p9 }
 0x6e9   : > { %2698 = shalt.err (!%p2695_p1)
}
 0x6ea   : > { %s2738_s12 = smov 128   ;;  %s2739_s13 = smov 8  }
 0x6eb   : > { %2610 = dma.vmem_to_hbm [thread:$0]  (%p2838_p5), %s3253_s15, 256, %s3258_s25, %s3260_s24, %s2738_s12, %s2738_s12, %s2739_s13  }
 0x6ec PF: > { %p2616_p2 = scmp.ge.s32.totalorder %s2733_s20, 2  ;;  %s1946_s0 = sand.u32 1, %s2721_s17  }
 0x6ed   : > { %s1947_s29 = scalar_lea.sflag [#allocation3], %s1946_s0 }
 0x6ee   : > { %p2613_p3 = pnand %p2616_p2, %p2842_p6 }
 0x6f0   : > { %2716 = dma.done.wait (!%p2613_p3), %s1947_s29, 256  }
 0x6f1   : > { %2718 = vsyncadd (!%p2613_p3), %s1947_s29, 4294967040  ;;  %p21_p4 = scmp.ge.s32.totalorder %s2825_s23, 4   ;;  %s3317_s17 = smov %s2725_s18 }
 0x6f2   : > { %s3318_s18 = smov %s2729_s19  ;;  %s3319_s19 = smov %s2836_s26 }
 0x6f3   : > { %s3320_s20 = smov %s2825_s23  ;;  %23 = sbr.rel (!%p21_p4) target bundleno = 5 (0x5), region = 107 }
 0x6fa   :  { %1952 = vsyncpa [#allocation3], 1 }
 0x6fb   :  { %1954 = vsyncpa [#allocation3 + $0x1], 1 }

</bundles_post_ra>
